<compile_context>
chip_gen: v6e
topology: v6e:2x2x1
jax: 0.10.0
libtpu: 0.0.40
codegen_flags: <defaults>
</compile_context>

<pallas_src>
import numpy as np
import jax
import jax.numpy as jnp
from jax import lax
from jax.experimental import pallas as pl
from jax.experimental.pallas import tpu as pltpu  # noqa: F401  (TPU backend; kept for compiler params if needed)

# ----------------------- small, deterministic config -----------------------
B = 2              # batch
C = 4              # input channels
T = 8              # temporal length
H = 8
W = 8
FEATURE_SIZE = 32  # backbone feature size
DIM = 16           # MoCo projection dim
K_QUEUE = 32       # queue length
N_SERIES = 2
SERIES_DIM = 8
TEMP_T = 0.07
ALIGNED_T = 0.07
EPS = 1e-12

S_SPATIAL = T * H * W            # 512 positions per clip
ND = N_SERIES * SERIES_DIM       # 16
OUTW = DIM + ND                  # 32 packed cols per encoder: [ q (16) | series (16) ]
NQ = 3 * B                       # clips through encoder_q: x1, aug_x1, shuffled_aug_x1
NK = B                           # clips through encoder_k: x2
NTOT = NQ + NK                   # 4B = 8 clips total
LOGITS_W = 1 + K_QUEUE           # 33
XW = NTOT * S_SPATIAL            # 4096 lane width of the activation slab

F2 = 2 * FEATURE_SIZE            # 64  (stacked q|k backbone features)
F4 = 4 * FEATURE_SIZE            # 128 (stacked q|k first-head widths)
W2C = 2 * OUTW                   # 64  (stacked q|k packed output widths)

# ---- packed f32 parameter-slab row offsets (each section starts at a multiple of 8) ----
R_WBB = 0                        # (2F, C+1)  stacked backbone weight | bias
R_W1 = R_WBB + F2                # (2F, 4F)   block-diag fused first head layer (1/S folded in)
R_W2 = R_W1 + F2                 # (4F, 2*OUTW) block-diag fused second head layer
R_G = R_W2 + F4                  # (2*OUTW, 2*OUTW) group-norm mask
R_QUE = R_G + W2C                # (DIM, K)   clip queue
R_NEG = R_QUE + DIM              # (d, K)     per-dim series-queue negative sums
R_B1 = R_NEG + SERIES_DIM        # (1, 4F)
R_B2 = R_B1 + 1                  # (1, 2*OUTW)
W_SLAB_ROWS = R_B2 + 1           # 346

# ---- packed bf16 activation-slab row offsets ----
R_X = 0                          # rows 0 : C+1   transposed clips + ones bias row
R_P = 8                          # rows 8 : 8+NTOT {0,1} pooling mask (aligned to sublane group)
A_SLAB_ROWS = R_P + NTOT         # 16

# ---- merged lane-dense output slab layout ----
ROW_PACK = 0                     # rows 0:NTOT, cols 0:OUTW   packed normalized embeddings
ROW_CLIP = NTOT                  # rows NTOT:NTOT+B, cols 0:33 clip logits
ROW_TC = NTOT + B                # rows NTOT+B:NTOT+2B, cols 0:33 tc logits
OUT_ROWS = 16
OUT_COLS = 128

assert F4 <= OUT_COLS and W2C <= OUT_COLS and LOGITS_W <= OUT_COLS and ROW_TC + B <= OUT_ROWS
assert C + 1 <= R_P


# =============================== Pallas kernel ===============================

def _fused_forward_kernel(a_ref, w_ref, out_ref):
    """Stand-in backbone + avg-pool + fused (block-diagonal) q/k projection heads for all 4B
    clips in a single pass, plus clip / temporal-consistency contrastive logits, written into
    one lane-dense (16, 128) output slab. Single invocation, everything resident in VMEM."""
    out_ref[...] = jnp.zeros_like(out_ref)               # one full lane-dense store for the pad regions

    x = a_ref[R_X:R_X + C + 1, :]                        # (C+1, XW) bf16; last row == 1 (bias fold)
    pool = a_ref[R_P:R_P + NTOT, :]                      # (NTOT, XW) bf16 {0,1} pooling mask

    # stand-in backbone: pointwise conv C -> F for both encoders at once, + ReLU
    wbb = w_ref[R_WBB:R_WBB + F2, 0:C + 1].astype(jnp.bfloat16)        # (2F, C+1)
    h = jnp.dot(wbb, x, preferred_element_type=jnp.float32)            # (2F, XW) f32 accumulate
    h = jnp.maximum(h, 0.0).astype(jnp.bfloat16)

    # AdaptiveAvgPool3d((1,1,1)) for all clips via one block-mask matmul (1/S folded into w1)
    feat = lax.dot_general(pool, h, (((1,), (1,)), ((), ())),
                           preferred_element_type=jnp.float32)         # (NTOT, 2F)

    # fused projection heads: block-diag(q heads, k heads), both layers = two matmuls total
    w1 = w_ref[R_W1:R_W1 + F2, 0:F4]
    b1 = w_ref[R_B1:R_B1 + 1, 0:F4]
    h1 = jnp.maximum(jnp.dot(feat, w1, preferred_element_type=jnp.float32) + b1, 0.0)   # (NTOT, 4F)

    w2 = w_ref[R_W2:R_W2 + F4, 0:W2C]
    b2 = w_ref[R_B2:R_B2 + 1, 0:W2C]
    u = jnp.dot(h1, w2, preferred_element_type=jnp.float32) + b2       # (NTOT, 2*OUTW)

    # per-group L2 normalization (q vector + each series vector, per encoder) via mask matmul
    gmask = w_ref[R_G:R_G + W2C, 0:W2C]
    nsq = jnp.dot(u * u, gmask, preferred_element_type=jnp.float32)
    un = u * lax.rsqrt(jnp.maximum(nsq, EPS * EPS))                    # rsqrt -> EUP slot

    # packed embeddings: q-encoder clips keep the left half, k-encoder clips the right half
    out_ref[ROW_PACK:ROW_PACK + NQ, 0:OUTW] = un[0:NQ, 0:OUTW]
    out_ref[ROW_PACK + NQ:ROW_PACK + NTOT, 0:OUTW] = un[NQ:NTOT, OUTW:W2C]

    # ---------------- clip contrastive logits ----------------
    q_n = un[0:B, 0:DIM]                                 # x1 through encoder_q
    k_n = un[NQ:NTOT, OUTW:OUTW + DIM]                   # x2 through encoder_k
    queue = w_ref[R_QUE:R_QUE + DIM, 0:K_QUEUE]
    inv_t = 1.0 / TEMP_T
    out_ref[ROW_CLIP:ROW_CLIP + B, 0:1] = jnp.sum(q_n * k_n, axis=1, keepdims=True) * inv_t
    out_ref[ROW_CLIP:ROW_CLIP + B, 1:LOGITS_W] = (
        jnp.dot(q_n, queue, preferred_element_type=jnp.float32) * inv_t)

    # -------- temporal-consistency contrastive logits --------
    base_s = sum(un[0:B, DIM + g * SERIES_DIM:DIM + (g + 1) * SERIES_DIM]
                 for g in range(N_SERIES))               # x1 series, summed over groups
    pos_s = sum(un[NQ:NTOT, OUTW + DIM + g * SERIES_DIM:OUTW + DIM + (g + 1) * SERIES_DIM]
                for g in range(N_SERIES))                # x2 series (key), summed over groups
    negsum = w_ref[R_NEG:R_NEG + SERIES_DIM, 0:K_QUEUE]
    s = (1.0 / float(N_SERIES * N_SERIES)) / ALIGNED_T
    out_ref[ROW_TC:ROW_TC + B, 0:1] = jnp.sum(base_s * pos_s, axis=1, keepdims=True) * s
    out_ref[ROW_TC:ROW_TC + B, 1:LOGITS_W] = (
        jnp.dot(base_s, negsum, preferred_element_type=jnp.float32) * s)


# ============================ wrapper-side packing ============================

def _blockdiag(a, b):
    ra, ca = a.shape
    rb, cb = b.shape
    return jnp.concatenate([
        jnp.concatenate([a, jnp.zeros((ra, cb), jnp.float32)], axis=1),
        jnp.concatenate([jnp.zeros((rb, ca), jnp.float32), b], axis=1)], axis=0)


def _pad_lanes(a, width=OUT_COLS):
    return jnp.pad(a, ((0, 0), (0, width - a.shape[1])))


def _group_mask_full():
    """G[i,j] = 1 iff packed output columns i,j are in the same L2-norm group; block-diag over q/k."""
    g = np.zeros((OUTW,), np.int64)
    for s in range(N_SERIES):
        g[DIM + s * SERIES_DIM:DIM + (s + 1) * SERIES_DIM] = s + 1
    G = (g[:, None] == g[None, :]).astype(np.float32)
    Gf = np.zeros((W2C, W2C), np.float32)
    Gf[:OUTW, :OUTW] = G
    Gf[OUTW:, OUTW:] = G
    return jnp.asarray(Gf)


def _build_param_slab(params_q, params_k, queue, negsum):
    """Pack both encoders' params (+ queue, negsum, masks) into ONE lane-dense f32 slab."""
    (wbbq, bbbq, w1q, b1q, w2q, b2q, ws1q, bs1q, ws2q, bs2q) = params_q
    (wbbk, bbbk, w1k, b1k, w2k, b2k, ws1k, bs1k, ws2k, bs2k) = params_k

    # stacked backbone (q rows on top of k rows), bias folded as an extra column
    wbb_aug = jnp.concatenate([
        jnp.concatenate([wbbq.T, bbbq.T], axis=1),
        jnp.concatenate([wbbk.T, bbbk.T], axis=1)], axis=0)             # (2F, C+1)

    # first head layer: [q-head | series-head] per encoder, block-diag over encoders,
    # with the adaptive-avg-pool mean (1/S) folded into the weights.
    w1_full = _blockdiag(jnp.concatenate([w1q, ws1q], axis=1),
                         jnp.concatenate([w1k, ws1k], axis=1)) * (1.0 / S_SPATIAL)   # (2F, 4F)
    b1_full = jnp.concatenate([b1q, bs1q, b1k, bs1k], axis=1)           # (1, 4F)

    # second head layer: block-diag within each encoder and across encoders
    w2_full = _blockdiag(_blockdiag(w2q, ws2q), _blockdiag(w2k, ws2k))  # (4F, 2*OUTW)
    b2_full = jnp.concatenate([b2q, bs2q, b2k, bs2k], axis=1)           # (1, 2*OUTW)

    slab = jnp.concatenate([
        _pad_lanes(wbb_aug),            # R_WBB
        _pad_lanes(w1_full),            # R_W1
        _pad_lanes(w2_full),            # R_W2
        _pad_lanes(_group_mask_full()),  # R_G
        _pad_lanes(queue),              # R_QUE
        _pad_lanes(negsum),             # R_NEG
        _pad_lanes(b1_full),            # R_B1
        _pad_lanes(b2_full),            # R_B2
    ], axis=0)
    assert slab.shape == (W_SLAB_ROWS, OUT_COLS)
    return slab


# ============================== JAX glue (losses) ==============================

def cross_entropy_zero_labels(logits):
    # nn.CrossEntropyLoss with all labels == 0, mean reduction
    return jnp.mean(jax.nn.logsumexp(logits, axis=1) - logits[:, 0])


def calc_ranking_losses(feat_unaug, feat_aug, weight=0.5):
    """Both ranking-loss invocations batched into one similarity computation (plain XLA)."""
    Bn = feat_unaug.shape[0]
    M = 2 * N_SERIES
    feats = jnp.concatenate([feat_unaug, feat_aug], axis=0)              # (2Bn, n, 2, d)
    f = jnp.transpose(feats, (0, 2, 1, 3)).reshape(2 * Bn, M, SERIES_DIM)
    sim = jnp.einsum('bmd,bnd->bmn', f, f)                               # (2Bn, M, M)
    corr_cols = jnp.array([(i + N_SERIES) % M for i in range(M)], jnp.int32)
    left_cols = jnp.array([[j for j in range(M) if j != i and j != (i + N_SERIES) % M]
                           for i in range(M)], jnp.int32)
    rows = jnp.arange(M)
    highest = sim[:, rows, corr_cols][:, :, None]                        # (2Bn, M, 1)
    second = sim[:, rows[:, None], left_cols]                            # (2Bn, M, M-2)
    # numerically-safe equivalent of log(1 + exp(diff / 0.05))
    soft = jax.nn.softplus((second - highest) / 0.05)
    margin_logits = jnp.concatenate([highest, second], axis=2)           # (2Bn, M, M-1)
    labels = jnp.zeros((Bn * M,), dtype=jnp.int32)
    return {
        'unaug_ranking_margin_logits': margin_logits[:Bn].reshape(-1, M - 1),
        'unaug_ranking_margin_labels': labels,
        'unaug_ranking_margin_contrast_loss': weight * jnp.mean(soft[:Bn]),
        'aug_ranking_margin_logits': margin_logits[Bn:].reshape(-1, M - 1),
        'aug_ranking_margin_labels': labels,
        'aug_ranking_margin_contrast_loss': weight * jnp.mean(soft[Bn:]),
    }


# ================================ forward pass ================================

def moco_forward(block, params_q, params_k, queue, series_queue, perm_key):
    """block: (B, 3, C, T, H, W) float32."""
    x1 = block[:, 0]
    x2 = block[:, 1]
    aug_x1 = block[:, 2]

    # per-sample temporal shuffle of aug_x1 along the series axis
    aug_g = aug_x1.reshape(B, C, N_SERIES, T // N_SERIES, H, W)
    keys = jax.random.split(perm_key, B)
    sample_indices = jnp.stack(
        [jax.random.permutation(keys[i], N_SERIES) for i in range(B)]).astype(jnp.int32)  # (B, n)
    shuffled = jnp.take_along_axis(
        aug_g, sample_indices[:, None, :, None, None, None], axis=2).reshape(B, C, T, H, W)

    # ---- activation slab: transposed lane-dense layout + ones bias row + pooling mask ----
    x_all = jnp.concatenate([x1, aug_x1, shuffled, x2], axis=0)          # (4B, C, T, H, W)
    xT = jnp.transpose(x_all, (1, 0, 2, 3, 4)).reshape(C, XW)            # (C, NTOT*S)
    ones_row = jnp.ones((1, XW), jnp.float32)                            # folds the backbone bias
    xpad = jnp.zeros((R_P - (C + 1), XW), jnp.float32)                   # align pooling mask to sublane group
    p_mask = jnp.asarray(np.repeat(np.eye(NTOT, dtype=np.float32), S_SPATIAL, axis=1))
    a_slab = jnp.concatenate([xT, ones_row, xpad, p_mask], axis=0).astype(jnp.bfloat16)

    # ---- packed parameter slab (both encoders fused; one DMA) ----
    # queue.T.view(K, n, d) summed over n  ==  per-dim negative sums (d, K)
    negsum = series_queue.reshape(N_SERIES, SERIES_DIM, K_QUEUE).sum(axis=0)
    w_slab = _build_param_slab(params_q, params_k, queue, negsum)

    out = pl.pallas_call(
        _fused_forward_kernel,
        out_shape=jax.ShapeDtypeStruct((OUT_ROWS, OUT_COLS), jnp.float32),
    )(a_slab, w_slab)

    packed = out[ROW_PACK:ROW_PACK + NTOT, :OUTW]                        # (4B, 32)
    clip_logits = out[ROW_CLIP:ROW_CLIP + B, :LOGITS_W]
    tc_logits = out[ROW_TC:ROW_TC + B, :LOGITS_W]
    labels = jnp.zeros((B,), dtype=jnp.int32)

    ret = {
        'clip_logits': clip_logits, 'clip_labels': labels,
        'clip_contrast_loss': cross_entropy_zero_labels(clip_logits),
        'tc_logits': tc_logits, 'tc_labels': labels,
        'tc_contrast_loss': cross_entropy_zero_labels(tc_logits),
    }

    # TODO(synk): _momentum_update_key_encoder / _dequeue_and_enqueue skipped (stateful, train-only)
    # TODO(synk): distributed all_gather / batch shuffle skipped (distributed=False semantics)

    series_features = packed[:B, DIM:].reshape(B, N_SERIES, SERIES_DIM)          # x1 series
    aug_series = packed[B:2 * B, DIM:].reshape(B, N_SERIES, SERIES_DIM)          # aug series
    shuf_series = packed[2 * B:3 * B, DIM:].reshape(B, N_SERIES, SERIES_DIM)     # shuffled series

    # torch.scatter with a permutation index == inverse-permute the shuffled features
    inv = jnp.argsort(sample_indices, axis=1)
    calibrated = jnp.take_along_axis(shuf_series, inv[:, :, None], axis=1)       # (B, n, d)

    orig_shuffled = jnp.stack([series_features, calibrated], axis=2)             # (B, n, 2, d)
    aug_shuffled = jnp.stack([aug_series, calibrated], axis=2)
    ret.update(calc_ranking_losses(orig_shuffled, aug_shuffled, weight=0.5))
    return ret


# ============================= deterministic init =============================

def init_params(key):
    ks = jax.random.split(key, 10)

    def lin(k, fan_in, shape):
        return jax.random.normal(k, shape, jnp.float32) / jnp.sqrt(float(fan_in))

    wbb = lin(ks[0], C, (C, FEATURE_SIZE))
    bbb = 0.01 * jax.random.normal(ks[1], (1, FEATURE_SIZE), jnp.float32)
    w1 = lin(ks[2], FEATURE_SIZE, (FEATURE_SIZE, FEATURE_SIZE))
    b1 = 0.01 * jax.random.normal(ks[3], (1, FEATURE_SIZE), jnp.float32)
    w2 = lin(ks[4], FEATURE_SIZE, (FEATURE_SIZE, DIM))
    b2 = 0.01 * jax.random.normal(ks[5], (1, DIM), jnp.float32)
    ws1 = lin(ks[6], FEATURE_SIZE, (FEATURE_SIZE, FEATURE_SIZE))
    bs1 = 0.01 * jax.random.normal(ks[7], (1, FEATURE_SIZE), jnp.float32)
    ws2 = lin(ks[8], FEATURE_SIZE, (FEATURE_SIZE, ND))
    bs2 = 0.01 * jax.random.normal(ks[9], (1, ND), jnp.float32)
    return (wbb, bbb, w1, b1, w2, b2, ws1, bs1, ws2, bs2)


if __name__ == "__main__":
    key = jax.random.PRNGKey(0)
    k_params, k_queue, k_sq, k_block, k_perm = jax.random.split(key, 5)

    params_q = init_params(k_params)
    params_k = params_q  # encoder_k is initialized as an exact copy of encoder_q

    queue = jax.random.normal(k_queue, (DIM, K_QUEUE), jnp.float32)
    queue = queue / jnp.maximum(jnp.linalg.norm(queue, axis=0, keepdims=True), EPS)

    series_queue = jax.random.normal(k_sq, (ND, K_QUEUE), jnp.float32)
    sq = series_queue.reshape(N_SERIES, SERIES_DIM, K_QUEUE)
    sq = sq / jnp.maximum(jnp.linalg.norm(sq, axis=1, keepdims=True), EPS)
    series_queue = sq.reshape(ND, K_QUEUE)

    block = jax.random.normal(k_block, (B, 3, C, T, H, W), jnp.float32)

    fwd = jax.jit(moco_forward)
    ret = fwd(block, params_q, params_k, queue, series_queue, k_perm)
    jax.block_until_ready(ret)
    print("KERNEL_OK")
</pallas_src>

<mosaic_0001>
module attributes {stable_mosaic.version = 11 : i64} {
  func.func @_fused_forward_kernel(%arg0: memref<16x4096xbf16, #tpu.memory_space<vmem>>, %arg1: memref<346x128xf32, #tpu.memory_space<vmem>>, %arg2: memref<16x128xf32, #tpu.memory_space<vmem>>) attributes {dimension_semantics = [], scalar_prefetch = 0 : i64, scratch_operands = 0 : i64, tpu.core_type = #tpu.core_type<tc>} {
    %cst = arith.constant 0.000000e+00 : f32
    %0 = vector.broadcast %cst : f32 to vector<16x128xf32>
    %c0 = arith.constant 0 : index
    %c0_0 = arith.constant 0 : index
    %1 = vector.load %arg2[%c0, %c0_0] : memref<16x128xf32, #tpu.memory_space<vmem>>, vector<16x128xf32>
    tpu.vector_store %arg2[%c0, %c0_0], %0 {strides = array<i32>} : memref<16x128xf32, #tpu.memory_space<vmem>>, vector<16x128xf32>,
    %c0_1 = arith.constant 0 : index
    %c0_2 = arith.constant 0 : index
    %2 = vector.load %arg0[%c0_1, %c0_2] : memref<16x4096xbf16, #tpu.memory_space<vmem>>, vector<5x4096xbf16>
    %c8 = arith.constant 8 : index
    %c0_3 = arith.constant 0 : index
    %3 = vector.load %arg0[%c8, %c0_3] : memref<16x4096xbf16, #tpu.memory_space<vmem>>, vector<8x4096xbf16>
    %c0_4 = arith.constant 0 : index
    %c0_5 = arith.constant 0 : index
    %4 = vector.load %arg1[%c0_4, %c0_5] : memref<346x128xf32, #tpu.memory_space<vmem>>, vector<64x5xf32>
    %5 = arith.truncf %4 : vector<64x5xf32> to vector<64x5xbf16>
    %cst_6 = arith.constant dense<0.000000e+00> : vector<64x4096xf32>
    %6 = tpu.matmul %5, %2, %cst_6 {dimension_numbers = #tpu.dot_dimension_numbers<[1], [0], [0], [1], [0, 0, 1, 1], [], []>} : vector<64x5xbf16>, vector<5x4096xbf16>, vector<64x4096xf32> -> vector<64x4096xf32>
    %cst_7 = arith.constant 0.000000e+00 : f32
    %7 = vector.broadcast %cst_7 : f32 to vector<64x4096xf32>
    %8 = arith.maximumf %6, %7 : vector<64x4096xf32>
    %9 = arith.truncf %8 : vector<64x4096xf32> to vector<64x4096xbf16>
    %cst_8 = arith.constant dense<0.000000e+00> : vector<8x64xf32>
    %10 = tpu.matmul %3, %9, %cst_8 {dimension_numbers = #tpu.dot_dimension_numbers<[1], [1], [0], [0], [0, 0, 1, 0], [], []>} : vector<8x4096xbf16>, vector<64x4096xbf16>, vector<8x64xf32> -> vector<8x64xf32>
    %c64 = arith.constant 64 : index
    %c0_9 = arith.constant 0 : index
    %11 = vector.load %arg1[%c64, %c0_9] : memref<346x128xf32, #tpu.memory_space<vmem>>, vector<64x128xf32>
    %c344 = arith.constant 344 : index
    %c0_10 = arith.constant 0 : index
    %12 = vector.load %arg1[%c344, %c0_10] : memref<346x128xf32, #tpu.memory_space<vmem>>, vector<1x128xf32>
    %cst_11 = arith.constant dense<0.000000e+00> : vector<8x128xf32>
    %13 = tpu.matmul %10, %11, %cst_11 {dimension_numbers = #tpu.dot_dimension_numbers<[1], [0], [0], [1], [0, 0, 1, 1], [], []>} : vector<8x64xf32>, vector<64x128xf32>, vector<8x128xf32> -> vector<8x128xf32>
    %14 = vector.broadcast %12 : vector<1x128xf32> to vector<8x128xf32>
    %15 = arith.addf %13, %14 : vector<8x128xf32>
    %cst_12 = arith.constant 0.000000e+00 : f32
    %16 = vector.broadcast %cst_12 : f32 to vector<8x128xf32>
    %17 = arith.maximumf %15, %16 : vector<8x128xf32>
    %c128 = arith.constant 128 : index
    %c0_13 = arith.constant 0 : index
    %18 = vector.load %arg1[%c128, %c0_13] : memref<346x128xf32, #tpu.memory_space<vmem>>, vector<128x64xf32>
    %c345 = arith.constant 345 : index
    %c0_14 = arith.constant 0 : index
    %19 = vector.load %arg1[%c345, %c0_14] : memref<346x128xf32, #tpu.memory_space<vmem>>, vector<1x64xf32>
    %cst_15 = arith.constant dense<0.000000e+00> : vector<8x64xf32>
    %20 = tpu.matmul %17, %18, %cst_15 {dimension_numbers = #tpu.dot_dimension_numbers<[1], [0], [0], [1], [0, 0, 1, 1], [], []>} : vector<8x128xf32>, vector<128x64xf32>, vector<8x64xf32> -> vector<8x64xf32>
    %21 = vector.broadcast %19 : vector<1x64xf32> to vector<8x64xf32>
    %22 = arith.addf %20, %21 : vector<8x64xf32>
    %c256 = arith.constant 256 : index
    %c0_16 = arith.constant 0 : index
    %23 = vector.load %arg1[%c256, %c0_16] : memref<346x128xf32, #tpu.memory_space<vmem>>, vector<64x64xf32>
    %24 = arith.mulf %22, %22 : vector<8x64xf32>
    %cst_17 = arith.constant dense<0.000000e+00> : vector<8x64xf32>
    %25 = tpu.matmul %24, %23, %cst_17 {dimension_numbers = #tpu.dot_dimension_numbers<[1], [0], [0], [1], [0, 0, 1, 1], [], []>} : vector<8x64xf32>, vector<64x64xf32>, vector<8x64xf32> -> vector<8x64xf32>
    %cst_18 = arith.constant 1.000000e-24 : f32
    %26 = vector.broadcast %cst_18 : f32 to vector<8x64xf32>
    %27 = arith.maximumf %25, %26 : vector<8x64xf32>
    %28 = math.rsqrt %27 : vector<8x64xf32>
    %29 = arith.mulf %22, %28 : vector<8x64xf32>
    %30 = vector.extract_strided_slice %29 {offsets = [0, 0], sizes = [6, 32], strides = [1, 1]} : vector<8x64xf32> to vector<6x32xf32>
    %c0_19 = arith.constant 0 : index
    %c0_20 = arith.constant 0 : index
    %31 = vector.load %arg2[%c0_19, %c0_20] : memref<16x128xf32, #tpu.memory_space<vmem>>, vector<6x32xf32>
    tpu.vector_store %arg2[%c0_19, %c0_20], %30 {strides = array<i32>} : memref<16x128xf32, #tpu.memory_space<vmem>>, vector<6x32xf32>,
    %32 = vector.extract_strided_slice %29 {offsets = [6, 32], sizes = [2, 32], strides = [1, 1]} : vector<8x64xf32> to vector<2x32xf32>
    %c6 = arith.constant 6 : index
    %c0_21 = arith.constant 0 : index
    %33 = vector.load %arg2[%c6, %c0_21] : memref<16x128xf32, #tpu.memory_space<vmem>>, vector<2x32xf32>
    tpu.vector_store %arg2[%c6, %c0_21], %32 {strides = array<i32>} : memref<16x128xf32, #tpu.memory_space<vmem>>, vector<2x32xf32>,
    %34 = vector.extract_strided_slice %29 {offsets = [0, 0], sizes = [2, 16], strides = [1, 1]} : vector<8x64xf32> to vector<2x16xf32>
    %35 = vector.extract_strided_slice %29 {offsets = [6, 32], sizes = [2, 16], strides = [1, 1]} : vector<8x64xf32> to vector<2x16xf32>
    %c320 = arith.constant 320 : index
    %c0_22 = arith.constant 0 : index
    %36 = vector.load %arg1[%c320, %c0_22] : memref<346x128xf32, #tpu.memory_space<vmem>>, vector<16x32xf32>
    %37 = arith.mulf %34, %35 : vector<2x16xf32>
    %cst_23 = arith.constant dense<0.000000e+00> : vector<2xf32>
    %38 = vector.multi_reduction <add>, %37, %cst_23 [1] : vector<2x16xf32> to vector<2xf32>
    %39 = vector.shape_cast %38 : vector<2xf32> to vector<2x1xf32>
    %cst_24 = arith.constant 14.2857141 : f32
    %40 = vector.broadcast %cst_24 : f32 to vector<2x1xf32>
    %41 = arith.mulf %39, %40 : vector<2x1xf32>
    %c8_25 = arith.constant 8 : index
    %c0_26 = arith.constant 0 : index
    %42 = vector.load %arg2[%c8_25, %c0_26] : memref<16x128xf32, #tpu.memory_space<vmem>>, vector<2x1xf32>
    tpu.vector_store %arg2[%c8_25, %c0_26], %41 {strides = array<i32>} : memref<16x128xf32, #tpu.memory_space<vmem>>, vector<2x1xf32>,
    %cst_27 = arith.constant dense<0.000000e+00> : vector<2x32xf32>
    %43 = tpu.matmul %34, %36, %cst_27 {dimension_numbers = #tpu.dot_dimension_numbers<[1], [0], [0], [1], [0, 0, 1, 1], [], []>} : vector<2x16xf32>, vector<16x32xf32>, vector<2x32xf32> -> vector<2x32xf32>
    %cst_28 = arith.constant 14.2857141 : f32
    %44 = vector.broadcast %cst_28 : f32 to vector<2x32xf32>
    %45 = arith.mulf %43, %44 : vector<2x32xf32>
    %c8_29 = arith.constant 8 : index
    %c1 = arith.constant 1 : index
    %46 = vector.load %arg2[%c8_29, %c1] : memref<16x128xf32, #tpu.memory_space<vmem>>, vector<2x32xf32>
    tpu.vector_store %arg2[%c8_29, %c1], %45 {strides = array<i32>} : memref<16x128xf32, #tpu.memory_space<vmem>>, vector<2x32xf32>,
    %47 = vector.extract_strided_slice %29 {offsets = [0, 16], sizes = [2, 8], strides = [1, 1]} : vector<8x64xf32> to vector<2x8xf32>
    %cst_30 = arith.constant 0.000000e+00 : f32
    %48 = vector.broadcast %cst_30 : f32 to vector<2x8xf32>
    %49 = arith.addf %48, %47 : vector<2x8xf32>
    %50 = vector.extract_strided_slice %29 {offsets = [0, 24], sizes = [2, 8], strides = [1, 1]} : vector<8x64xf32> to vector<2x8xf32>
    %51 = arith.addf %49, %50 : vector<2x8xf32>
    %52 = vector.extract_strided_slice %29 {offsets = [6, 48], sizes = [2, 8], strides = [1, 1]} : vector<8x64xf32> to vector<2x8xf32>
    %cst_31 = arith.constant 0.000000e+00 : f32
    %53 = vector.broadcast %cst_31 : f32 to vector<2x8xf32>
    %54 = arith.addf %53, %52 : vector<2x8xf32>
    %55 = vector.extract_strided_slice %29 {offsets = [6, 56], sizes = [2, 8], strides = [1, 1]} : vector<8x64xf32> to vector<2x8xf32>
    %56 = arith.addf %54, %55 : vector<2x8xf32>
    %c336 = arith.constant 336 : index
    %c0_32 = arith.constant 0 : index
    %57 = vector.load %arg1[%c336, %c0_32] : memref<346x128xf32, #tpu.memory_space<vmem>>, vector<8x32xf32>
    %58 = arith.mulf %51, %56 : vector<2x8xf32>
    %cst_33 = arith.constant dense<0.000000e+00> : vector<2xf32>
    %59 = vector.multi_reduction <add>, %58, %cst_33 [1] : vector<2x8xf32> to vector<2xf32>
    %60 = vector.shape_cast %59 : vector<2xf32> to vector<2x1xf32>
    %cst_34 = arith.constant 3.57142854 : f32
    %61 = vector.broadcast %cst_34 : f32 to vector<2x1xf32>
    %62 = arith.mulf %60, %61 : vector<2x1xf32>
    %c10 = arith.constant 10 : index
    %c0_35 = arith.constant 0 : index
    %63 = vector.load %arg2[%c10, %c0_35] : memref<16x128xf32, #tpu.memory_space<vmem>>, vector<2x1xf32>
    tpu.vector_store %arg2[%c10, %c0_35], %62 {strides = array<i32>} : memref<16x128xf32, #tpu.memory_space<vmem>>, vector<2x1xf32>,
    %cst_36 = arith.constant dense<0.000000e+00> : vector<2x32xf32>
    %64 = tpu.matmul %51, %57, %cst_36 {dimension_numbers = #tpu.dot_dimension_numbers<[1], [0], [0], [1], [0, 0, 1, 1], [], []>} : vector<2x8xf32>, vector<8x32xf32>, vector<2x32xf32> -> vector<2x32xf32>
    %cst_37 = arith.constant 3.57142854 : f32
    %65 = vector.broadcast %cst_37 : f32 to vector<2x32xf32>
    %66 = arith.mulf %64, %65 : vector<2x32xf32>
    %c10_38 = arith.constant 10 : index
    %c1_39 = arith.constant 1 : index
    %67 = vector.load %arg2[%c10_38, %c1_39] : memref<16x128xf32, #tpu.memory_space<vmem>>, vector<2x32xf32>
    tpu.vector_store %arg2[%c10_38, %c1_39], %66 {strides = array<i32>} : memref<16x128xf32, #tpu.memory_space<vmem>>, vector<2x32xf32>,
    return
  }
}

</mosaic_0001>

<bundles_post_ra>
// kernel: moco_forward.31
= control target key start
LH: loop header
LB: loop body
LE: loop exit
PB: predicated region body
PF: predicated region fallthrough
CT: control target
= control target key end

     0   :  { %vm151_vm0 = vcmask 1041408   ;;  %vm152_vm1 = vcmask 1042432   ;;  %v3361_v1 = vmov 65535   ;;  %v3362_v4 = vmov 0   ;;  %s3365_s22 = smov 120   ;;  %s3366_s27 = smov 112   ;;  %s4492_s0 = inlined_call_operand.vmem [shape: bf16[16,4096], index: 0, kind: input, shape index: {}]   ;;  %s4493_s1 = inlined_call_operand.vmem [shape: f32[346,128], index: 1, kind: input, shape index: {}]   ;;  %s4494_s2 = inlined_call_operand.vmem [shape: f32[16,128], index: 2, kind: output, shape index: {}]  }
   0x1   :  { %v14_v0 = vld [vmem:[%s4492_s0] sm:$0x77]  ;;  %v153_v2 = vsel %vm151_vm0, 4294967295, %v3361_v1  ;;  %v15_v3 = vld [vmem:[%s4492_s0 + $0x8] sm:$0x77]  ;;  %283 = vmatprep.mubr.bf16.mxu0 %v3362_v4  ;;  %356 = vmatprep.mubr.bf16.mxu1 %v3362_v4  ;;  %vm138_vm2 = vcmask 39936  }
   0x2   :  { %v3029_v5 = vcombine.high %v14_v0, %v14_v0  ;;  %v3392_v6 = vsel %vm152_vm1, %v153_v2, 0  ;;  %v3031_v7 = vcombine.high %v15_v3, %v15_v3  ;;  %v3028_v8 = vcombine.low %v14_v0, %v14_v0  ;;  %v16_v9 = vld [vmem:[%s4492_s0 + $0x10] sm:$0x77]  ;;  %v17_v10 = vld [vmem:[%s4492_s0 + $0x18] sm:$0x77]  ;;  %v46_v12 = vld [vmem:[%s4493_s1] sm:$0xff] }
   0x3   :  { %v3030_v11 = vcombine.low %v15_v3, %v15_v3  ;;  %v47_v13 = vld [vmem:[%s4493_s1 + $0x8] sm:$0xff]  ;;  %v3032_v14 = vcombine.low %v16_v9, %v16_v9  ;;  %v3033_v18 = vcombine.high %v16_v9, %v16_v9  ;;  %v3034_v20 = vcombine.low %v17_v10, %v17_v10  ;;  %v18_v22 = vld [vmem:[%s4492_s0 + $0x20] sm:$0x77]  ;;  %v48_v33 = vld [vmem:[%s4493_s1 + $0x10] sm:$0xff]  ;;  %s3367_s28 = smov 96  }
   0x4   :  { %v159_v15 = vand.u32 %v3029_v5, %v3392_v6  ;;  %v165_v16 = vand.u32 %v3031_v7, %v3392_v6  ;;  %v156_v17 = vand.u32 %v3028_v8, %v3392_v6  ;;  %v3035_v21 = vcombine.high %v17_v10, %v17_v10  ;;  %v19_v23 = vld [vmem:[%s4492_s0 + $0x28] sm:$0x77]  ;;  %v49_v34 = vld [vmem:[%s4493_s1 + $0x18] sm:$0xff]  ;;  %v50_v36 = vld [vmem:[%s4493_s1 + $0x20] sm:$0xff] }
   0x5   :  { %v162_v19 = vand.u32 %v3030_v11, %v3392_v6  ;;  %v3416_v24 = vpack.c.bf16 %v47_v13, %v46_v12  ;;  %v171_v25 = vand.u32 %v3033_v18, %v3392_v6  ;;  %v168_v26 = vand.u32 %v3032_v14, %v3392_v6  ;;  %v51_v37 = vld [vmem:[%s4493_s1 + $0x28] sm:$0xff]  ;;  %v52_v39 = vld [vmem:[%s4493_s1 + $0x30] sm:$0xff]  ;;  %v53_v40 = vld [vmem:[%s4493_s1 + $0x38] sm:$0xff] }
   0x6   :  { %265 = vmatprep.subr.bf16.mxu0 %v159_v15  ;;  %338 = vmatprep.subr.bf16.mxu1 %v165_v16  ;;  %v177_v27 = vand.u32 %v3035_v21, %v3392_v6  ;;  %v174_v28 = vand.u32 %v3034_v20, %v3392_v6  ;;  %v3037_v29 = vcombine.high %v18_v22, %v18_v22  ;;  %v20_v42 = vld [vmem:[%s4492_s0 + $0x30] sm:$0x77]  ;;  %v21_v43 = vld [vmem:[%s4492_s0 + $0x38] sm:$0x77]  ;;  %v22_v52 = vld [vmem:[%s4492_s0 + $0x40] sm:$0x77] }
   0x7   :  { %266 = vmatpush1.bf16.msra.mxu0 %v156_v17  ;;  %339 = vmatpush1.bf16.msra.mxu1 %v162_v19  ;;  %v3039_v30 = vcombine.high %v19_v23, %v19_v23  ;;  %v3436_v35 = vpack.c.bf16 %v49_v34, %v48_v33  ;;  %v3450_v38 = vpack.c.bf16 %v51_v37, %v50_v36  ;;  %v23_v53 = vld [vmem:[%s4492_s0 + $0x48] sm:$0x77]  ;;  %v24_v62 = vld [vmem:[%s4492_s0 + $0x50] sm:$0x77]  ;;  %v25_v63 = vld [vmem:[%s4492_s0 + $0x58] sm:$0x77] }
   0x8   :  { %411 = vmatprep.subr.bf16.mxu0 %v171_v25  ;;  %484 = vmatprep.subr.bf16.mxu1 %v177_v27  ;;  %v183_v31 = vand.u32 %v3037_v29, %v3392_v6  ;;  %v3464_v41 = vpack.c.bf16 %v53_v40, %v52_v39  ;;  %v3036_v44 = vcombine.low %v18_v22, %v18_v22  ;;  %v26_v10 = vld [vmem:[%s4492_s0 + $0x60] sm:$0x77]  ;;  %v27_v11 = vld [vmem:[%s4492_s0 + $0x68] sm:$0x77]  ;;  %v28_v20 = vld [vmem:[%s4492_s0 + $0x70] sm:$0x77] }
   0x9   :  { %v189_v32 = vand.u32 %v3039_v30, %v3392_v6  ;;  %v3038_v45 = vcombine.low %v19_v23, %v19_v23  ;;  %v3041_v46 = vcombine.high %v20_v42, %v20_v42  ;;  %v3043_v47 = vcombine.high %v21_v43, %v21_v43  ;;  %v29_v21 = vld [vmem:[%s4492_s0 + $0x78] sm:$0x77] }
   0xa   :  { %3060 = vmatmul.mubr.msk.bf16.vlgmr.msra.gmra.mxu0 %vm138_vm2, %v3416_v24  ;;  %3064 = vmatmul.mubr.msk.bf16.vlgmr.msra.gmra.mxu1 %vm138_vm2, %v3416_v24  ;;  %v180_v48 = vand.u32 %v3036_v44, %v3392_v6  ;;  %v3040_v54 = vcombine.low %v20_v42, %v20_v42  ;;  %v3042_v55 = vcombine.low %v21_v43, %v21_v43  ;;  %vm3364_vm3 = vmmov 0  }
   0xb   :  { %412 = vmatpush1.bf16.msra.mxu0 %v168_v26  ;;  %485 = vmatpush1.bf16.msra.mxu1 %v174_v28  ;;  %v186_v49 = vand.u32 %v3038_v45, %v3392_v6  ;;  %v195_v50 = vand.u32 %v3041_v46, %v3392_v6  ;;  %v201_v51 = vand.u32 %v3043_v47, %v3392_v6  ;;  %vm2568_vm4 = vcmask 523264  }
   0xc   :  { %293 = vmatprep.mubr.bf16.mxu0 %v3362_v4  ;;  %366 = vmatprep.mubr.bf16.mxu1 %v3362_v4  ;;  %v3045_v56 = vcombine.high %v22_v52, %v22_v52  ;;  %v3047_v57 = vcombine.high %v23_v53, %v23_v53  ;;  %v192_v58 = vand.u32 %v3040_v54, %v3392_v6  ;;  %vm2841_vm5 = vcmask 130048  }
   0xd   :  { %557 = vmatprep.subr.bf16.mxu0 %v183_v31  ;;  %630 = vmatprep.subr.bf16.mxu1 %v189_v32  ;;  %v198_v59 = vand.u32 %v3042_v55, %v3392_v6  ;;  %v3044_v0 = vcombine.low %v22_v52, %v22_v52  ;;  %v3046_v1 = vcombine.low %v23_v53, %v23_v53  ;;  %vm2819_vm6 = vcmask 259072  }
   0xe   :  { %v207_v60 = vand.u32 %v3045_v56, %v3392_v6  ;;  %v213_v61 = vand.u32 %v3047_v57, %v3392_v6  ;;  %v3049_v2 = vcombine.high %v24_v62, %v24_v62  ;;  %v3051_v3 = vcombine.high %v25_v63, %v25_v63 }
   0xf   :  { %v204_v5 = vand.u32 %v3044_v0, %v3392_v6  ;;  %v210_v7 = vand.u32 %v3046_v1, %v3392_v6  ;;  %v3048_v12 = vcombine.low %v24_v62, %v24_v62  ;;  %v3050_v13 = vcombine.low %v25_v63, %v25_v63 }
  0x10   :  { %v219_v8 = vand.u32 %v3049_v2, %v3392_v6  ;;  %v225_v9 = vand.u32 %v3051_v3, %v3392_v6  ;;  %v3053_v14 = vcombine.high %v26_v10, %v26_v10  ;;  %v3055_v15 = vcombine.high %v27_v11, %v27_v11 }
  0x11   :  { %v216_v16 = vand.u32 %v3048_v12, %v3392_v6  ;;  %v222_v17 = vand.u32 %v3050_v13, %v3392_v6  ;;  %v3052_v22 = vcombine.low %v26_v10, %v26_v10  ;;  %v3054_v23 = vcombine.low %v27_v11, %v27_v11 }
  0x12   :  { %3061 = vmatmul.mubr.msk.bf16.gmra.mxu0 %vm138_vm2, %v3436_v35  ;;  %3065 = vmatmul.mubr.msk.bf16.gmra.mxu1 %vm138_vm2, %v3436_v35  ;;  %v231_v18 = vand.u32 %v3053_v14, %v3392_v6  ;;  %v237_v19 = vand.u32 %v3055_v15, %v3392_v6  ;;  %v3057_v25 = vcombine.high %v28_v20, %v28_v20  ;;  %vm2945_vm7 = vcmask 64512  }
  0x13   :  { %303 = vmatprep.mubr.bf16.mxu0 %v3362_v4  ;;  %376 = vmatprep.mubr.bf16.mxu1 %v3362_v4  ;;  %v3059_v26 = vcombine.high %v29_v21, %v29_v21  ;;  %v228_v27 = vand.u32 %v3052_v22, %v3392_v6  ;;  %v234_v28 = vand.u32 %v3054_v23, %v3392_v6  ;;  %vm2834_vm8 = vcmask 123904  }
  0x14   :  { %v243_v29 = vand.u32 %v3057_v25, %v3392_v6  ;;  %v3056_v31 = vcombine.low %v28_v20, %v28_v20  ;;  %v3058_v32 = vcombine.low %v29_v21, %v29_v21  ;;  %vm2937_vm9 = vcmask 58368  }
  0x15   :  { %v249_v30 = vand.u32 %v3059_v26, %v3392_v6  ;;  %vm2839_vm10 = vcmask 1024   ;;  %vm2919_vm11 = vcmask 263176   ;;  %vm2825_vm12 = vcmask 261126  }
  0x16   :  { %v240_v33 = vand.u32 %v3056_v31, %v3392_v6  ;;  %v246_v34 = vand.u32 %v3058_v32, %v3392_v6 }
  0x1a   :  { %3062 = vmatmul.mubr.msk.bf16.gmra.mxu0 %vm138_vm2, %v3450_v38  ;;  %3066 = vmatmul.mubr.msk.bf16.gmra.mxu1 %vm138_vm2, %v3450_v38 }
  0x1b   :  { %313 = vmatprep.mubr.bf16.mxu0 %v3362_v4  ;;  %386 = vmatprep.mubr.bf16.mxu1 %v3362_v4 }
  0x22   :  { %3063 = vmatmul.mubr.msk.bf16.gmra.mxu0 %vm138_vm2, %v3464_v41  ;;  %3067 = vmatmul.mubr.msk.bf16.gmra.mxu1 %vm138_vm2, %v3464_v41 }
  0x23   :  { %429 = vmatprep.mubr.bf16.mxu0 %v3362_v4  ;;  %502 = vmatprep.mubr.bf16.mxu1 %v3362_v4 }
  0x2a   :  { %3068 = vmatmul.mubr.msk.bf16.vlgmr.msra.gmra.mxu0 %vm138_vm2, %v3416_v24  ;;  %3072 = vmatmul.mubr.msk.bf16.vlgmr.msra.gmra.mxu1 %vm138_vm2, %v3416_v24 }
  0x2b   :  { %558 = vmatpush1.bf16.msra.mxu0 %v180_v48  ;;  %631 = vmatpush1.bf16.msra.mxu1 %v186_v49 }
  0x2c   :  { %439 = vmatprep.mubr.bf16.mxu0 %v3362_v4  ;;  %512 = vmatprep.mubr.bf16.mxu1 %v3362_v4 }
  0x2d   :  { %703 = vmatprep.subr.bf16.mxu0 %v195_v50  ;;  %776 = vmatprep.subr.bf16.mxu1 %v201_v51 }
  0x32   :  { %3069 = vmatmul.mubr.msk.bf16.gmra.mxu0 %vm138_vm2, %v3436_v35  ;;  %3073 = vmatmul.mubr.msk.bf16.gmra.mxu1 %vm138_vm2, %v3436_v35 }
  0x33   :  { %449 = vmatprep.mubr.bf16.mxu0 %v3362_v4  ;;  %522 = vmatprep.mubr.bf16.mxu1 %v3362_v4 }
  0x3a   :  { %3070 = vmatmul.mubr.msk.bf16.gmra.mxu0 %vm138_vm2, %v3450_v38  ;;  %3074 = vmatmul.mubr.msk.bf16.gmra.mxu1 %vm138_vm2, %v3450_v38 }
  0x3b   :  { %459 = vmatprep.mubr.bf16.mxu0 %v3362_v4  ;;  %532 = vmatprep.mubr.bf16.mxu1 %v3362_v4 }
  0x42   :  { %3071 = vmatmul.mubr.msk.bf16.gmra.mxu0 %vm138_vm2, %v3464_v41  ;;  %3075 = vmatmul.mubr.msk.bf16.gmra.mxu1 %vm138_vm2, %v3464_v41 }
  0x43   :  { %575 = vmatprep.mubr.bf16.mxu0 %v3362_v4  ;;  %648 = vmatprep.mubr.bf16.mxu1 %v3362_v4 }
  0x4a   :  { %3076 = vmatmul.mubr.msk.bf16.vlgmr.msra.gmra.mxu0 %vm138_vm2, %v3416_v24  ;;  %3080 = vmatmul.mubr.msk.bf16.vlgmr.msra.gmra.mxu1 %vm138_vm2, %v3416_v24 }
  0x4b   :  { %704 = vmatpush1.bf16.msra.mxu0 %v192_v58  ;;  %777 = vmatpush1.bf16.msra.mxu1 %v198_v59 }
  0x4c   :  { %585 = vmatprep.mubr.bf16.mxu0 %v3362_v4  ;;  %658 = vmatprep.mubr.bf16.mxu1 %v3362_v4 }
  0x4d   :  { %849 = vmatprep.subr.bf16.mxu0 %v207_v60  ;;  %922 = vmatprep.subr.bf16.mxu1 %v213_v61 }
  0x52   :  { %3077 = vmatmul.mubr.msk.bf16.gmra.mxu0 %vm138_vm2, %v3436_v35  ;;  %3081 = vmatmul.mubr.msk.bf16.gmra.mxu1 %vm138_vm2, %v3436_v35 }
  0x53   :  { %595 = vmatprep.mubr.bf16.mxu0 %v3362_v4  ;;  %668 = vmatprep.mubr.bf16.mxu1 %v3362_v4 }
  0x5a   :  { %3078 = vmatmul.mubr.msk.bf16.gmra.mxu0 %vm138_vm2, %v3450_v38  ;;  %3082 = vmatmul.mubr.msk.bf16.gmra.mxu1 %vm138_vm2, %v3450_v38 }
  0x5b   :  { %605 = vmatprep.mubr.bf16.mxu0 %v3362_v4  ;;  %678 = vmatprep.mubr.bf16.mxu1 %v3362_v4 }
  0x62   :  { %3079 = vmatmul.mubr.msk.bf16.gmra.mxu0 %vm138_vm2, %v3464_v41  ;;  %3083 = vmatmul.mubr.msk.bf16.gmra.mxu1 %vm138_vm2, %v3464_v41 }
  0x63   :  { %721 = vmatprep.mubr.bf16.mxu0 %v3362_v4  ;;  %794 = vmatprep.mubr.bf16.mxu1 %v3362_v4 }
  0x6a   :  { %3084 = vmatmul.mubr.msk.bf16.vlgmr.msra.gmra.mxu0 %vm138_vm2, %v3416_v24  ;;  %3088 = vmatmul.mubr.msk.bf16.vlgmr.msra.gmra.mxu1 %vm138_vm2, %v3416_v24 }
  0x6b   :  { %850 = vmatpush1.bf16.msra.mxu0 %v204_v5  ;;  %923 = vmatpush1.bf16.msra.mxu1 %v210_v7 }
  0x6c   :  { %731 = vmatprep.mubr.bf16.mxu0 %v3362_v4  ;;  %804 = vmatprep.mubr.bf16.mxu1 %v3362_v4 }
  0x6d   :  { %995 = vmatprep.subr.bf16.mxu0 %v219_v8  ;;  %1068 = vmatprep.subr.bf16.mxu1 %v225_v9 }
  0x72   :  { %3085 = vmatmul.mubr.msk.bf16.gmra.mxu0 %vm138_vm2, %v3436_v35  ;;  %3089 = vmatmul.mubr.msk.bf16.gmra.mxu1 %vm138_vm2, %v3436_v35 }
  0x73   :  { %741 = vmatprep.mubr.bf16.mxu0 %v3362_v4  ;;  %814 = vmatprep.mubr.bf16.mxu1 %v3362_v4 }
  0x7a   :  { %3086 = vmatmul.mubr.msk.bf16.gmra.mxu0 %vm138_vm2, %v3450_v38  ;;  %3090 = vmatmul.mubr.msk.bf16.gmra.mxu1 %vm138_vm2, %v3450_v38 }
  0x7b   :  { %751 = vmatprep.mubr.bf16.mxu0 %v3362_v4  ;;  %824 = vmatprep.mubr.bf16.mxu1 %v3362_v4 }
  0x82   :  { %3087 = vmatmul.mubr.msk.bf16.gmra.mxu0 %vm138_vm2, %v3464_v41  ;;  %3091 = vmatmul.mubr.msk.bf16.gmra.mxu1 %vm138_vm2, %v3464_v41 }
  0x83   :  { %867 = vmatprep.mubr.bf16.mxu0 %v3362_v4  ;;  %940 = vmatprep.mubr.bf16.mxu1 %v3362_v4 }
  0x8a   :  { %3092 = vmatmul.mubr.msk.bf16.vlgmr.msra.gmra.mxu0 %vm138_vm2, %v3416_v24  ;;  %3096 = vmatmul.mubr.msk.bf16.vlgmr.msra.gmra.mxu1 %vm138_vm2, %v3416_v24 }
  0x8b   :  { %996 = vmatpush1.bf16.msra.mxu0 %v216_v16  ;;  %1069 = vmatpush1.bf16.msra.mxu1 %v222_v17 }
  0x8c   :  { %877 = vmatprep.mubr.bf16.mxu0 %v3362_v4  ;;  %950 = vmatprep.mubr.bf16.mxu1 %v3362_v4 }
  0x8d   :  { %1141 = vmatprep.subr.bf16.mxu0 %v231_v18  ;;  %1214 = vmatprep.subr.bf16.mxu1 %v237_v19 }
  0x92   :  { %3093 = vmatmul.mubr.msk.bf16.gmra.mxu0 %vm138_vm2, %v3436_v35  ;;  %3097 = vmatmul.mubr.msk.bf16.gmra.mxu1 %vm138_vm2, %v3436_v35 }
  0x93   :  { %887 = vmatprep.mubr.bf16.mxu0 %v3362_v4  ;;  %960 = vmatprep.mubr.bf16.mxu1 %v3362_v4 }
  0x9a   :  { %3094 = vmatmul.mubr.msk.bf16.gmra.mxu0 %vm138_vm2, %v3450_v38  ;;  %3098 = vmatmul.mubr.msk.bf16.gmra.mxu1 %vm138_vm2, %v3450_v38 }
  0x9b   :  { %897 = vmatprep.mubr.bf16.mxu0 %v3362_v4  ;;  %970 = vmatprep.mubr.bf16.mxu1 %v3362_v4 }
  0xa2   :  { %3095 = vmatmul.mubr.msk.bf16.gmra.mxu0 %vm138_vm2, %v3464_v41  ;;  %3099 = vmatmul.mubr.msk.bf16.gmra.mxu1 %vm138_vm2, %v3464_v41 }
  0xa3   :  { %1013 = vmatprep.mubr.bf16.mxu0 %v3362_v4  ;;  %1086 = vmatprep.mubr.bf16.mxu1 %v3362_v4 }
  0xaa   :  { %3100 = vmatmul.mubr.msk.bf16.vlgmr.msra.gmra.mxu0 %vm138_vm2, %v3416_v24  ;;  %3104 = vmatmul.mubr.msk.bf16.vlgmr.msra.gmra.mxu1 %vm138_vm2, %v3416_v24 }
  0xab   :  { %1142 = vmatpush1.bf16.msra.mxu0 %v228_v27  ;;  %1215 = vmatpush1.bf16.msra.mxu1 %v234_v28 }
  0xac   :  { %1023 = vmatprep.mubr.bf16.mxu0 %v3362_v4  ;;  %1096 = vmatprep.mubr.bf16.mxu1 %v3362_v4 }
  0xad   :  { %1287 = vmatprep.subr.bf16.mxu0 %v243_v29  ;;  %1360 = vmatprep.subr.bf16.mxu1 %v249_v30 }
  0xb2   :  { %3101 = vmatmul.mubr.msk.bf16.gmra.mxu0 %vm138_vm2, %v3436_v35  ;;  %3105 = vmatmul.mubr.msk.bf16.gmra.mxu1 %vm138_vm2, %v3436_v35 }
  0xb3   :  { %1033 = vmatprep.mubr.bf16.mxu0 %v3362_v4  ;;  %1106 = vmatprep.mubr.bf16.mxu1 %v3362_v4 }
  0xba   :  { %3102 = vmatmul.mubr.msk.bf16.gmra.mxu0 %vm138_vm2, %v3450_v38  ;;  %3106 = vmatmul.mubr.msk.bf16.gmra.mxu1 %vm138_vm2, %v3450_v38 }
  0xbb   :  { %1043 = vmatprep.mubr.bf16.mxu0 %v3362_v4  ;;  %1116 = vmatprep.mubr.bf16.mxu1 %v3362_v4 }
  0xc2   :  { %3103 = vmatmul.mubr.msk.bf16.gmra.mxu0 %vm138_vm2, %v3464_v41  ;;  %3107 = vmatmul.mubr.msk.bf16.gmra.mxu1 %vm138_vm2, %v3464_v41 }
  0xc3   :  { %1159 = vmatprep.mubr.bf16.mxu0 %v3362_v4  ;;  %1232 = vmatprep.mubr.bf16.mxu1 %v3362_v4 }
  0xca   :  { %v3644_v36 = vpop.f32.mrf.mxu0  ;;  %v3646_v37 = vpop.f32.mrf.mxu1  ;;  %3108 = vmatmul.mubr.msk.bf16.vlgmr.msra.gmra.mxu0 %vm138_vm2, %v3416_v24  ;;  %3112 = vmatmul.mubr.msk.bf16.vlgmr.msra.gmra.mxu1 %vm138_vm2, %v3416_v24 }
  0xcb   :  { %1288 = vmatpush1.bf16.msra.mxu0 %v240_v33  ;;  %1361 = vmatpush1.bf16.msra.mxu1 %v246_v34 }
  0xcc   :  { %v3652_v39 = vpop.f32.mrf.mxu0  ;;  %v3654_v40 = vpop.f32.mrf.mxu1  ;;  %1169 = vmatprep.mubr.bf16.mxu0 %v3362_v4  ;;  %1242 = vmatprep.mubr.bf16.mxu1 %v3362_v4 }
  0xce   :  { %v3658_v6 = vpop.f32.mrf.mxu0  ;;  %v3660_v42 = vpop.f32.mrf.mxu1 }
  0xd0   :  { %v3662_v43 = vpop.f32.mrf.mxu0  ;;  %v3664_v44 = vpop.f32.mrf.mxu1 }
  0xd2   :  { %v3666_v45 = vpop.f32.mrf.mxu0  ;;  %v3668_v46 = vpop.f32.mrf.mxu1  ;;  %3109 = vmatmul.mubr.msk.bf16.gmra.mxu0 %vm138_vm2, %v3436_v35  ;;  %3113 = vmatmul.mubr.msk.bf16.gmra.mxu1 %vm138_vm2, %v3436_v35 }
  0xd3   :  { %1179 = vmatprep.mubr.bf16.mxu0 %v3362_v4  ;;  %1252 = vmatprep.mubr.bf16.mxu1 %v3362_v4 }
  0xd4   :  { %v3676_v47 = vpop.f32.mrf.mxu0  ;;  %v3678_v48 = vpop.f32.mrf.mxu1 }
  0xd6   :  { %v3680_v49 = vpop.f32.mrf.mxu0  ;;  %v3682_v50 = vpop.f32.mrf.mxu1 }
  0xd8   :  { %v3684_v51 = vpop.f32.mrf.mxu0  ;;  %v3686_v52 = vpop.f32.mrf.mxu1 }
  0xda   :  { %v3688_v53 = vpop.f32.mrf.mxu0  ;;  %v3690_v54 = vpop.f32.mrf.mxu1  ;;  %3110 = vmatmul.mubr.msk.bf16.gmra.mxu0 %vm138_vm2, %v3450_v38  ;;  %3114 = vmatmul.mubr.msk.bf16.gmra.mxu1 %vm138_vm2, %v3450_v38 }
  0xdb   :  { %1189 = vmatprep.mubr.bf16.mxu0 %v3362_v4  ;;  %1262 = vmatprep.mubr.bf16.mxu1 %v3362_v4 }
  0xdc   :  { %v307_v55 = vpop.f32.mrf.mxu0  ;;  %v380_v56 = vpop.f32.mrf.mxu1 }
  0xdd   :  { %v1548_v19 = vmax.f32 %v307_v55, 0.0  ;;  %v1550_v20 = vmax.f32 %v380_v56, 0.0  ;;  %v1516_v55 = vmax.f32 %v3684_v51, 0.0  ;;  %v1518_v56 = vmax.f32 %v3686_v52, 0.0 }
  0xde   :  { %v3698_v57 = vpop.f32.mrf.mxu0  ;;  %v3700_v58 = vpop.f32.mrf.mxu1  ;;  %v1486_v51 = vmax.f32 %v3678_v48, 0.0 }
  0xdf   :  { %v1579_v31 = vmax.f32 %v3698_v57, 0.0  ;;  %v1581_v32 = vmax.f32 %v3700_v58, 0.0  ;;  %v1484_v57 = vmax.f32 %v3676_v47, 0.0  ;;  %v1517_v47 = vmax.f32 %v3682_v50, 0.0 }
  0xe0   :  { %v311_v59 = vpop.f32.mrf.mxu0  ;;  %v384_v60 = vpop.f32.mrf.mxu1 }
  0xe1   :  { %v1580_v3 = vmax.f32 %v311_v59, 0.0  ;;  %v1582_v5 = vmax.f32 %v384_v60, 0.0  ;;  %v1547_v59 = vmax.f32 %v3688_v53, 0.0  ;;  %v1549_v60 = vmax.f32 %v3690_v54, 0.0 }
  0xe2   :  { %v315_v61 = vpop.f32.mrf.mxu0  ;;  %v388_v62 = vpop.f32.mrf.mxu1  ;;  %3111 = vmatmul.mubr.msk.bf16.gmra.mxu0 %vm138_vm2, %v3464_v41  ;;  %3115 = vmatmul.mubr.msk.bf16.gmra.mxu1 %vm138_vm2, %v3464_v41 }
  0xe3   :  { %1305 = vmatprep.mubr.bf16.mxu0 %v3362_v4  ;;  %1378 = vmatprep.mubr.bf16.mxu1 %v3362_v4  ;;  %v1611_v15 = vmax.f32 %v315_v61, 0.0  ;;  %v1613_v16 = vmax.f32 %v388_v62, 0.0  ;;  %v1740_v28 = vpack.c.bf16 %v1580_v3, %v1548_v19  ;;  %v1742_v29 = vpack.c.bf16 %v1582_v5, %v1550_v20 }
  0xe4   :  { %v317_v63 = vpop.f32.mrf.mxu0  ;;  %v390_v0 = vpop.f32.mrf.mxu1  ;;  %v1739_v52 = vpack.c.bf16 %v1579_v31, %v1547_v59  ;;  %v1741_v53 = vpack.c.bf16 %v1581_v32, %v1549_v60  ;;  %v1452_v5 = vmax.f32 %v3662_v43, 0.0  ;;  %v1422_v43 = vmax.f32 %v3654_v40, 0.0 }
  0xe5   :  { %v1612_v11 = vmax.f32 %v317_v63, 0.0  ;;  %v1614_v12 = vmax.f32 %v390_v0, 0.0  ;;  %v1708_v63 = vpack.c.bf16 %v1516_v55, %v1484_v57  ;;  %v1710_v0 = vpack.c.bf16 %v1518_v56, %v1486_v51 }
  0xe6   :  { %v319_v1 = vpop.f32.mrf.mxu0  ;;  %v392_v2 = vpop.f32.mrf.mxu1  ;;  %v1453_v19 = vmax.f32 %v3660_v42, 0.0 }
  0xe7   :  { %v1643_v7 = vmax.f32 %v319_v1, 0.0  ;;  %v1645_v8 = vmax.f32 %v392_v2, 0.0 }
  0xe8   :  { %v321_v9 = vpop.f32.mrf.mxu0  ;;  %v394_v10 = vpop.f32.mrf.mxu1 }
  0xe9   :  { %v1644_v13 = vmax.f32 %v321_v9, 0.0  ;;  %v1646_v14 = vmax.f32 %v394_v10, 0.0  ;;  %v1771_v23 = vpack.c.bf16 %v1643_v7, %v1611_v15  ;;  %v1773_v25 = vpack.c.bf16 %v1645_v8, %v1613_v16 }
  0xea   :  { %v3708_v17 = vpop.f32.mrf.mxu0  ;;  %v3710_v18 = vpop.f32.mrf.mxu1  ;;  %3116 = vmatmul.mubr.msk.bf16.vlgmr.msra.gmra.mxu0 %vm138_vm2, %v3416_v24  ;;  %3120 = vmatmul.mubr.msk.bf16.vlgmr.msra.gmra.mxu1 %vm138_vm2, %v3416_v24  ;;  %v1454_v7 = vmax.f32 %v3664_v44, 0.0  ;;  %v1483_v8 = vmax.f32 %v3666_v45, 0.0  ;;  %v1485_v9 = vmax.f32 %v3668_v46, 0.0  ;;  %v1451_v16 = vmax.f32 %v3658_v6, 0.0 }
  0xeb   :  { %v1772_v21 = vpack.c.bf16 %v1644_v13, %v1612_v11  ;;  %v1774_v22 = vpack.c.bf16 %v1646_v14, %v1614_v12  ;;  %1315 = vmatprep.mubr.bf16.mxu0 %v3362_v4  ;;  %1388 = vmatprep.mubr.bf16.mxu1 %v3362_v4  ;;  %v30_v12 = vld [vmem:[%s4492_s0 + $0x80] sm:$0xff] }
  0xec   :  { %v3718_v26 = vpop.f32.mrf.mxu0  ;;  %v3720_v27 = vpop.f32.mrf.mxu1  ;;  %v1709_v45 = vpack.c.bf16 %v1517_v47, %v1485_v9  ;;  %v1678_v40 = vpack.c.bf16 %v1454_v7, %v1422_v43  ;;  %v3124_v60 = vcombine.low %v30_v12, %v30_v12  ;;  %v3812_v7 = vld [vmem:[%s4492_s0 + $0x98] sm:$0xff] }
  0xed   :  { %1923 = vmatprep.subr.bf16.mxu0 %v1772_v21  ;;  %1963 = vmatprep.subr.bf16.mxu1 %v1774_v22  ;;  %v1419_v22 = vmax.f32 %v3644_v36, 0.0 }
  0xee   :  { %v3722_v30 = vpop.f32.mrf.mxu0  ;;  %v3724_v24 = vpop.f32.mrf.mxu1  ;;  %1924 = vmatpush1.bf16.xpose.msra.mxu0 %v1771_v23  ;;  %1964 = vmatpush1.bf16.xpose.msra.mxu1 %v1773_v25  ;;  %v1421_v23 = vmax.f32 %v3646_v37, 0.0 }
  0xef   :  { %1925 = vmatprep.subr.bf16.mxu0 %v1740_v28  ;;  %1965 = vmatprep.subr.bf16.mxu1 %v1742_v29  ;;  %v1675_v29 = vpack.c.bf16 %v1451_v16, %v1419_v22 }
  0xf0   :  { %v3728_v33 = vpop.f32.mrf.mxu0  ;;  %v3730_v34 = vpop.f32.mrf.mxu1  ;;  %v1677_v6 = vpack.c.bf16 %v1453_v19, %v1421_v23 }
  0xf2   :  { %v3736_v61 = vpop.f32.mrf.mxu0  ;;  %v3738_v62 = vpop.f32.mrf.mxu1  ;;  %3117 = vmatmul.mubr.msk.bf16.gmra.mxu0 %vm138_vm2, %v3436_v35  ;;  %3121 = vmatmul.mubr.msk.bf16.gmra.mxu1 %vm138_vm2, %v3436_v35  ;;  %v1515_v35 = vmax.f32 %v3680_v49, 0.0  ;;  %v1420_v49 = vmax.f32 %v3652_v39, 0.0 }
  0xf3   :  { %1325 = vmatprep.mubr.bf16.mxu0 %v3362_v4  ;;  %1398 = vmatprep.mubr.bf16.mxu1 %v3362_v4 }
  0xf4   :  { %v3748_v54 = vpop.f32.mrf.mxu0  ;;  %v3750_v58 = vpop.f32.mrf.mxu1  ;;  %v1707_v44 = vpack.c.bf16 %v1515_v35, %v1483_v8  ;;  %v1676_v39 = vpack.c.bf16 %v1452_v5, %v1420_v49 }
  0xf6   :  { %v3752_v1 = vpop.f32.mrf.mxu0  ;;  %v3754_v2 = vpop.f32.mrf.mxu1  ;;  %1926 = vmatpush1.bf16.xpose.msra.mxu0 %v1739_v52  ;;  %1966 = vmatpush1.bf16.xpose.msra.mxu1 %v1741_v53 }
  0xf7   :  { %1927 = vmatprep.subr.bf16.mxu0 %v1708_v63  ;;  %1967 = vmatprep.subr.bf16.mxu1 %v1710_v0  ;;  %v3803_v63 = vld [vmem:[%s4492_s0 + $0x90] sm:$0xff] }
  0xf8   :  { %v3758_v48 = vpop.f32.mrf.mxu0  ;;  %v3760_v3 = vpop.f32.mrf.mxu1 }
  0xfa   :  { %v3766_v10 = vpop.f32.mrf.mxu0  ;;  %v3768_v11 = vpop.f32.mrf.mxu1  ;;  %3118 = vmatmul.mubr.msk.bf16.gmra.mxu0 %vm138_vm2, %v3450_v38  ;;  %3122 = vmatmul.mubr.msk.bf16.gmra.mxu1 %vm138_vm2, %v3450_v38  ;;  %v31_v38 = vld [vmem:[%s4492_s0 + $0x88] sm:$0xff] }
  0xfb   :  { %1335 = vmatprep.mubr.bf16.mxu0 %v3362_v4  ;;  %1408 = vmatprep.mubr.bf16.mxu1 %v3362_v4  ;;  %v3125_v4 = vcombine.high %v30_v12, %v30_v12  ;;  %v3127_v15 = vcombine.high %v31_v38, %v31_v38  ;;  %v3126_v57 = vcombine.low %v31_v38, %v31_v38 }
  0xfc   :  { %v3778_v46 = vpop.f32.mrf.mxu0  ;;  %v3780_v50 = vpop.f32.mrf.mxu1 }
  0xfe   :  { %v3788_v13 = vpop.f32.mrf.mxu0  ;;  %v3790_v14 = vpop.f32.mrf.mxu1  ;;  %1928 = vmatpush1.bf16.xpose.msra.mxu0 %v1707_v44  ;;  %1968 = vmatpush1.bf16.xpose.msra.mxu1 %v1709_v45  ;;  %v1552_v44 = vmax.f32 %v3778_v46, 0.0  ;;  %v1554_v45 = vmax.f32 %v3780_v50, 0.0 }
  0xff   :  { %1929 = vmatprep.subr.bf16.mxu0 %v1676_v39  ;;  %1969 = vmatprep.subr.bf16.mxu1 %v1678_v40  ;;  %v3129_v39 = vcombine.high %v3803_v63, %v3803_v63  ;;  %v1583_v22 = vmax.f32 %v3788_v13, 0.0  ;;  %v1585_v23 = vmax.f32 %v3790_v14, 0.0  ;;  %v1490_v13 = vmax.f32 %v3750_v58, 0.0 }
 0x100   :  { %v457_v20 = vpop.f32.mrf.mxu0  ;;  %v530_v21 = vpop.f32.mrf.mxu1  ;;  %v1519_v58 = vmax.f32 %v3752_v1, 0.0 }
 0x101   :  { %v1584_v0 = vmax.f32 %v457_v20, 0.0  ;;  %v1586_v35 = vmax.f32 %v530_v21, 0.0 }
 0x102   :  { %v461_v25 = vpop.f32.mrf.mxu0  ;;  %v534_v28 = vpop.f32.mrf.mxu1  ;;  %3119 = vmatmul.mubr.msk.bf16.gmra.mxu0 %vm138_vm2, %v3464_v41  ;;  %3123 = vmatmul.mubr.msk.bf16.gmra.mxu1 %vm138_vm2, %v3464_v41 }
 0x103   :  { %1947 = vmatprep.mubr.bf16.mxu0 %v3125_v4  ;;  %1987 = vmatprep.mubr.bf16.mxu1 %v3127_v15  ;;  %v1615_v8 = vmax.f32 %v461_v25, 0.0  ;;  %v1617_v9 = vmax.f32 %v534_v28, 0.0  ;;  %v3131_v15 = vcombine.high %v3812_v7, %v3812_v7  ;;  %v1744_v16 = vpack.c.bf16 %v1584_v0, %v1552_v44 }
 0x104   :  { %v463_v31 = vpop.f32.mrf.mxu0  ;;  %v536_v42 = vpop.f32.mrf.mxu1  ;;  %v1746_v19 = vpack.c.bf16 %v1586_v35, %v1554_v45  ;;  %v1520_v25 = vmax.f32 %v3758_v48, 0.0  ;;  %v1522_v28 = vmax.f32 %v3760_v3, 0.0  ;;  %v1424_v0 = vmax.f32 %v3718_v26, 0.0 }
 0x105   :  { %v1616_v36 = vmax.f32 %v463_v31, 0.0  ;;  %v1618_v37 = vmax.f32 %v536_v42, 0.0  ;;  %v1551_v31 = vmax.f32 %v3766_v10, 0.0  ;;  %v1553_v42 = vmax.f32 %v3768_v11, 0.0 }
 0x106   :  { %v465_v32 = vpop.f32.mrf.mxu0  ;;  %v538_v55 = vpop.f32.mrf.mxu1  ;;  %1930 = vmatpush1.bf16.xpose.msra.mxu0 %v1675_v29  ;;  %1970 = vmatpush1.bf16.xpose.msra.mxu1 %v1677_v6  ;;  %v1714_v3 = vpack.c.bf16 %v1522_v28, %v1490_v13  ;;  %v1521_v11 = vmax.f32 %v3754_v2, 0.0  ;;  %v1426_v35 = vmax.f32 %v3720_v27, 0.0  ;;  %v1455_v26 = vmax.f32 %v3722_v30, 0.0 }
 0x107   :  { %v1647_v51 = vmax.f32 %v465_v32, 0.0  ;;  %v1649_v52 = vmax.f32 %v538_v55, 0.0  ;;  %v1488_v32 = vmax.f32 %v3748_v54, 0.0  ;;  %v1745_v48 = vpack.c.bf16 %v1585_v23, %v1553_v42 }
 0x108   :  { %v467_v56 = vpop.f32.mrf.mxu0  ;;  %v540_v59 = vpop.f32.mrf.mxu1  ;;  %v1457_v27 = vmax.f32 %v3724_v24, 0.0 }
 0x109   :  { %v1648_v53 = vmax.f32 %v467_v56, 0.0  ;;  %v1650_v41 = vmax.f32 %v540_v59, 0.0  ;;  %v1775_v40 = vpack.c.bf16 %v1647_v51, %v1615_v8  ;;  %v1777_v4 = vpack.c.bf16 %v1649_v52, %v1617_v9 }
 0x10a   :  { %v3805_v47 = vpop.f32.mrf.mxu0  ;;  %v3807_v5 = vpop.f32.mrf.mxu1 }
 0x10b   :  { %v1776_v49 = vpack.c.bf16 %v1648_v53, %v1616_v36  ;;  %v1778_v43 = vpack.c.bf16 %v1650_v41, %v1618_v37  ;;  %v1743_v36 = vpack.c.bf16 %v1583_v22, %v1551_v31  ;;  %v1712_v37 = vpack.c.bf16 %v1520_v25, %v1488_v32 }
 0x10c   :  { %v3816_v12 = vpop.f32.mrf.mxu0  ;;  %v3818_v38 = vpop.f32.mrf.mxu1  ;;  %v1487_v53 = vmax.f32 %v3736_v61, 0.0  ;;  %v1489_v41 = vmax.f32 %v3738_v62, 0.0 }
 0x10d   :  { %1948 = vmatmul.mubr.bf16.vlgmr.msra.gmra.mxu0 %v3124_v60  ;;  %1988 = vmatmul.mubr.bf16.vlgmr.msra.gmra.mxu1 %v3126_v57  ;;  %v1456_v60 = vmax.f32 %v3728_v33, 0.0  ;;  %v1458_v57 = vmax.f32 %v3730_v34, 0.0 }
 0x10e   :  { %2003 = vmatprep.subr.bf16.mxu0 %v1776_v49  ;;  %2043 = vmatprep.subr.bf16.mxu1 %v1778_v43  ;;  %v3824_v46 = vpop.f32.mrf.mxu0  ;;  %v3826_v50 = vpop.f32.mrf.mxu1  ;;  %v1711_v9 = vpack.c.bf16 %v1519_v58, %v1487_v53  ;;  %v1713_v2 = vpack.c.bf16 %v1521_v11, %v1489_v41  ;;  %v3130_v58 = vcombine.low %v3812_v7, %v3812_v7  ;;  %v3892_v11 = vld [vmem:[%s4492_s0 + $0xa8] sm:$0xff] }
 0x10f   :  { %2004 = vmatpush1.bf16.xpose.msra.mxu0 %v1775_v40  ;;  %2044 = vmatpush1.bf16.xpose.msra.mxu1 %v1777_v4  ;;  %v1680_v49 = vpack.c.bf16 %v1456_v60, %v1424_v0  ;;  %v1682_v33 = vpack.c.bf16 %v1458_v57, %v1426_v35  ;;  %v1425_v40 = vmax.f32 %v3710_v18, 0.0 }
 0x110   :  { %2005 = vmatprep.subr.bf16.mxu0 %v1744_v16  ;;  %2045 = vmatprep.subr.bf16.mxu1 %v1746_v19  ;;  %v3828_v20 = vpop.f32.mrf.mxu0  ;;  %v3830_v21 = vpop.f32.mrf.mxu1 }
 0x111   :  { %2027 = vmatprep.mubr.bf16.mxu0 %v3129_v39  ;;  %2067 = vmatprep.mubr.bf16.mxu1 %v3131_v15  ;;  %v1423_v39 = vmax.f32 %v3708_v17, 0.0  ;;  %v1681_v19 = vpack.c.bf16 %v1457_v27, %v1425_v40  ;;  %v3879_v17 = vld [vmem:[%s4492_s0 + $0xa0] sm:$0xff] }
 0x112   :  { %v3836_v29 = vpop.f32.mrf.mxu0  ;;  %v3838_v6 = vpop.f32.mrf.mxu1 }
 0x113   :  { %v1679_v16 = vpack.c.bf16 %v1455_v26, %v1423_v39 }
 0x114   :  { %v3844_v55 = vpop.f32.mrf.mxu0  ;;  %v3846_v14 = vpop.f32.mrf.mxu1 }
 0x116   :  { %v3848_v56 = vpop.f32.mrf.mxu0  ;;  %v3850_v59 = vpop.f32.mrf.mxu1 }
 0x117   :  { %2006 = vmatpush1.bf16.xpose.msra.mxu0 %v1743_v36  ;;  %2046 = vmatpush1.bf16.xpose.msra.mxu1 %v1745_v48 }
 0x118   :  { %2007 = vmatprep.subr.bf16.mxu0 %v1712_v37  ;;  %2047 = vmatprep.subr.bf16.mxu1 %v1714_v3  ;;  %v3852_v10 = vpop.f32.mrf.mxu0  ;;  %v3854_v54 = vpop.f32.mrf.mxu1  ;;  %v3128_v3 = vcombine.low %v3803_v63, %v3803_v63  ;;  %v3133_v63 = vcombine.high %v3879_v17, %v3879_v17 }
 0x119   :  { %v1524_v39 = vmax.f32 %v3852_v10, 0.0  ;;  %v1526_v40 = vmax.f32 %v3854_v54, 0.0 }
 0x11a   :  { %v3860_v51 = vpop.f32.mrf.mxu0  ;;  %v3862_v52 = vpop.f32.mrf.mxu1 }
 0x11c   :  { %v599_v8 = vpop.f32.mrf.mxu0  ;;  %v672_v1 = vpop.f32.mrf.mxu1 }
 0x11d   :  { %v1556_v0 = vmax.f32 %v599_v8, 0.0  ;;  %v1558_v35 = vmax.f32 %v672_v1, 0.0 }
 0x11e   :  { %v3868_v43 = vpop.f32.mrf.mxu0  ;;  %v3870_v34 = vpop.f32.mrf.mxu1 }
 0x11f   :  { %2008 = vmatpush1.bf16.xpose.msra.mxu0 %v1711_v9  ;;  %2048 = vmatpush1.bf16.xpose.msra.mxu1 %v1713_v2 }
 0x120   :  { %2009 = vmatprep.subr.bf16.mxu0 %v1680_v49  ;;  %2049 = vmatprep.subr.bf16.mxu1 %v1682_v33  ;;  %v603_v61 = vpop.f32.mrf.mxu0  ;;  %v676_v62 = vpop.f32.mrf.mxu1  ;;  %v3135_v33 = vcombine.high %v3892_v11, %v3892_v11 }
 0x121   :  { %v1588_v18 = vmax.f32 %v603_v61, 0.0  ;;  %v1590_v36 = vmax.f32 %v676_v62, 0.0 }
 0x122   :  { %v607_v44 = vpop.f32.mrf.mxu0  ;;  %v680_v45 = vpop.f32.mrf.mxu1 }
 0x123   :  { %v1619_v60 = vmax.f32 %v607_v44, 0.0  ;;  %v1621_v57 = vmax.f32 %v680_v45, 0.0  ;;  %v1748_v61 = vpack.c.bf16 %v1588_v18, %v1556_v0  ;;  %v1750_v62 = vpack.c.bf16 %v1590_v36, %v1558_v35 }
 0x124   :  { %v609_v4 = vpop.f32.mrf.mxu0  ;;  %v682_v15 = vpop.f32.mrf.mxu1  ;;  %v1587_v44 = vmax.f32 %v3868_v43, 0.0  ;;  %v1589_v45 = vmax.f32 %v3870_v34, 0.0  ;;  %v1494_v43 = vmax.f32 %v3846_v14, 0.0  ;;  %v1523_v14 = vmax.f32 %v3848_v56, 0.0 }
 0x125   :  { %v1620_v25 = vmax.f32 %v609_v4, 0.0  ;;  %v1622_v28 = vmax.f32 %v682_v15, 0.0  ;;  %v1491_v18 = vmax.f32 %v3836_v29, 0.0  ;;  %v1493_v36 = vmax.f32 %v3838_v6, 0.0 }
 0x126   :  { %v611_v22 = vpop.f32.mrf.mxu0  ;;  %v684_v23 = vpop.f32.mrf.mxu1  ;;  %v1718_v54 = vpack.c.bf16 %v1526_v40, %v1494_v43 }
 0x127   :  { %2010 = vmatpush1.bf16.xpose.msra.mxu0 %v1679_v16  ;;  %2050 = vmatpush1.bf16.xpose.msra.mxu1 %v1681_v19  ;;  %v1651_v42 = vmax.f32 %v611_v22, 0.0  ;;  %v1653_v24 = vmax.f32 %v684_v23, 0.0  ;;  %v1555_v16 = vmax.f32 %v3860_v51, 0.0  ;;  %v1557_v19 = vmax.f32 %v3862_v52, 0.0 }
 0x128   :  { %v613_v31 = vpop.f32.mrf.mxu0  ;;  %v686_v30 = vpop.f32.mrf.mxu1  ;;  %v1492_v22 = vmax.f32 %v3844_v55, 0.0  ;;  %v1525_v52 = vmax.f32 %v3850_v59, 0.0 }
 0x129   :  { %v1652_v32 = vmax.f32 %v613_v31, 0.0  ;;  %v1654_v13 = vmax.f32 %v686_v30, 0.0  ;;  %v1779_v49 = vpack.c.bf16 %v1651_v42, %v1619_v60  ;;  %v1781_v7 = vpack.c.bf16 %v1653_v24, %v1621_v57 }
 0x12a   :  { %v3881_v48 = vpop.f32.mrf.mxu0  ;;  %v3883_v37 = vpop.f32.mrf.mxu1  ;;  %v1749_v10 = vpack.c.bf16 %v1589_v45, %v1557_v19  ;;  %v1460_v42 = vmax.f32 %v3828_v20, 0.0  ;;  %v1462_v24 = vmax.f32 %v3830_v21, 0.0  ;;  %v1715_v57 = vpack.c.bf16 %v1523_v14, %v1491_v18 }
 0x12b   :  { %v1780_v53 = vpack.c.bf16 %v1652_v32, %v1620_v25  ;;  %v1782_v41 = vpack.c.bf16 %v1654_v13, %v1622_v28  ;;  %v1747_v25 = vpack.c.bf16 %v1587_v44, %v1555_v16  ;;  %v1716_v28 = vpack.c.bf16 %v1524_v39, %v1492_v22 }
 0x12c   :  { %v3894_v9 = vpop.f32.mrf.mxu0  ;;  %v3896_v2 = vpop.f32.mrf.mxu1  ;;  %v1717_v59 = vpack.c.bf16 %v1525_v52, %v1493_v36  ;;  %v3134_v14 = vcombine.low %v3892_v11, %v3892_v11  ;;  %v3970_v52 = vld [vmem:[%s4492_s0 + $0xb8] sm:$0xff] }
 0x12d   :  { %2083 = vmatprep.subr.bf16.mxu0 %v1780_v53  ;;  %2123 = vmatprep.subr.bf16.mxu1 %v1782_v41 }
 0x12e   :  { %2028 = vmatmul.mubr.bf16.vlgmr.msra.gmra.mxu0 %v3128_v3  ;;  %2068 = vmatmul.mubr.bf16.vlgmr.msra.gmra.mxu1 %v3130_v58  ;;  %v3902_v8 = vpop.f32.mrf.mxu0  ;;  %v3904_v1 = vpop.f32.mrf.mxu1  ;;  %v1428_v3 = vmax.f32 %v3816_v12, 0.0  ;;  %v1430_v58 = vmax.f32 %v3818_v38, 0.0  ;;  %v1459_v12 = vmax.f32 %v3824_v46, 0.0  ;;  %v1461_v38 = vmax.f32 %v3826_v50, 0.0 }
 0x12f   :  { %2084 = vmatpush1.bf16.xpose.msra.mxu0 %v1779_v49  ;;  %2124 = vmatpush1.bf16.xpose.msra.mxu1 %v1781_v7  ;;  %v1429_v49 = vmax.f32 %v3807_v5, 0.0 }
 0x130   :  { %2085 = vmatprep.subr.bf16.mxu0 %v1748_v61  ;;  %2125 = vmatprep.subr.bf16.mxu1 %v1750_v62  ;;  %v3906_v26 = vpop.f32.mrf.mxu0  ;;  %v3908_v27 = vpop.f32.mrf.mxu1  ;;  %v1684_v53 = vpack.c.bf16 %v1460_v42, %v1428_v3  ;;  %v1686_v20 = vpack.c.bf16 %v1462_v24, %v1430_v58 }
 0x131   :  { %2107 = vmatprep.mubr.bf16.mxu0 %v3133_v63  ;;  %2147 = vmatprep.mubr.bf16.mxu1 %v3135_v33  ;;  %v1427_v63 = vmax.f32 %v3805_v47, 0.0  ;;  %v1685_v62 = vpack.c.bf16 %v1461_v38, %v1429_v49  ;;  %v3957_v47 = vld [vmem:[%s4492_s0 + $0xb0] sm:$0xff] }
 0x132   :  { %v3914_v4 = vpop.f32.mrf.mxu0  ;;  %v3916_v15 = vpop.f32.mrf.mxu1 }
 0x133   :  { %v1683_v61 = vpack.c.bf16 %v1459_v12, %v1427_v63 }
 0x134   :  { %v3922_v23 = vpop.f32.mrf.mxu0  ;;  %v3924_v34 = vpop.f32.mrf.mxu1 }
 0x136   :  { %v3926_v31 = vpop.f32.mrf.mxu0  ;;  %v3928_v30 = vpop.f32.mrf.mxu1 }
 0x137   :  { %2086 = vmatpush1.bf16.xpose.msra.mxu0 %v1747_v25  ;;  %2126 = vmatpush1.bf16.xpose.msra.mxu1 %v1749_v10 }
 0x138   :  { %2087 = vmatprep.subr.bf16.mxu0 %v1716_v28  ;;  %2127 = vmatprep.subr.bf16.mxu1 %v1718_v54  ;;  %v3930_v51 = vpop.f32.mrf.mxu0  ;;  %v3932_v55 = vpop.f32.mrf.mxu1  ;;  %v3132_v54 = vcombine.low %v3879_v17, %v3879_v17  ;;  %v3137_v17 = vcombine.high %v3957_v47, %v3957_v47 }
 0x139   :  { %v1528_v63 = vmax.f32 %v3930_v51, 0.0  ;;  %v1530_v49 = vmax.f32 %v3932_v55, 0.0 }
 0x13a   :  { %v3938_v32 = vpop.f32.mrf.mxu0  ;;  %v3940_v13 = vpop.f32.mrf.mxu1 }
 0x13c   :  { %v745_v60 = vpop.f32.mrf.mxu0  ;;  %v818_v56 = vpop.f32.mrf.mxu1 }
 0x13d   :  { %v1560_v3 = vmax.f32 %v745_v60, 0.0  ;;  %v1562_v58 = vmax.f32 %v818_v56, 0.0 }
 0x13e   :  { %v3946_v41 = vpop.f32.mrf.mxu0  ;;  %v3948_v21 = vpop.f32.mrf.mxu1 }
 0x13f   :  { %2088 = vmatpush1.bf16.xpose.msra.mxu0 %v1715_v57  ;;  %2128 = vmatpush1.bf16.xpose.msra.mxu1 %v1717_v59 }
 0x140   :  { %2089 = vmatprep.subr.bf16.mxu0 %v1684_v53  ;;  %2129 = vmatprep.subr.bf16.mxu1 %v1686_v20  ;;  %v749_v29 = vpop.f32.mrf.mxu0  ;;  %v822_v6 = vpop.f32.mrf.mxu1  ;;  %v3139_v20 = vcombine.high %v3970_v52, %v3970_v52 }
 0x141   :  { %v1592_v5 = vmax.f32 %v749_v29, 0.0  ;;  %v1594_v25 = vmax.f32 %v822_v6, 0.0 }
 0x142   :  { %v753_v0 = vpop.f32.mrf.mxu0  ;;  %v826_v35 = vpop.f32.mrf.mxu1 }
 0x143   :  { %v1623_v42 = vmax.f32 %v753_v0, 0.0  ;;  %v1625_v24 = vmax.f32 %v826_v35, 0.0  ;;  %v1752_v29 = vpack.c.bf16 %v1592_v5, %v1560_v3  ;;  %v1754_v6 = vpack.c.bf16 %v1594_v25, %v1562_v58 }
 0x144   :  { %v755_v7 = vpop.f32.mrf.mxu0  ;;  %v828_v33 = vpop.f32.mrf.mxu1  ;;  %v1591_v0 = vmax.f32 %v3946_v41, 0.0  ;;  %v1593_v35 = vmax.f32 %v3948_v21, 0.0  ;;  %v1498_v41 = vmax.f32 %v3924_v34, 0.0  ;;  %v1527_v34 = vmax.f32 %v3926_v31, 0.0 }
 0x145   :  { %v1624_v39 = vmax.f32 %v755_v7, 0.0  ;;  %v1626_v40 = vmax.f32 %v828_v33, 0.0  ;;  %v1495_v5 = vmax.f32 %v3914_v4, 0.0  ;;  %v1497_v25 = vmax.f32 %v3916_v15, 0.0 }
 0x146   :  { %v757_v44 = vpop.f32.mrf.mxu0  ;;  %v830_v45 = vpop.f32.mrf.mxu1  ;;  %v1722_v55 = vpack.c.bf16 %v1530_v49, %v1498_v41 }
 0x147   :  { %2090 = vmatpush1.bf16.xpose.msra.mxu0 %v1683_v61  ;;  %2130 = vmatpush1.bf16.xpose.msra.mxu1 %v1685_v62  ;;  %v1655_v19 = vmax.f32 %v757_v44, 0.0  ;;  %v1657_v50 = vmax.f32 %v830_v45, 0.0  ;;  %v1559_v61 = vmax.f32 %v3938_v32, 0.0  ;;  %v1561_v62 = vmax.f32 %v3940_v13, 0.0 }
 0x148   :  { %v759_v16 = vpop.f32.mrf.mxu0  ;;  %v832_v46 = vpop.f32.mrf.mxu1  ;;  %v1496_v44 = vmax.f32 %v3922_v23, 0.0  ;;  %v1529_v13 = vmax.f32 %v3928_v30, 0.0 }
 0x149   :  { %v1656_v22 = vmax.f32 %v759_v16, 0.0  ;;  %v1658_v43 = vmax.f32 %v832_v46, 0.0  ;;  %v1783_v53 = vpack.c.bf16 %v1655_v19, %v1623_v42  ;;  %v1785_v11 = vpack.c.bf16 %v1657_v50, %v1625_v24 }
 0x14a   :  { %v3959_v10 = vpop.f32.mrf.mxu0  ;;  %v3961_v28 = vpop.f32.mrf.mxu1  ;;  %v1753_v51 = vpack.c.bf16 %v1593_v35, %v1561_v62  ;;  %v1464_v19 = vmax.f32 %v3906_v26, 0.0  ;;  %v1466_v50 = vmax.f32 %v3908_v27, 0.0  ;;  %v1719_v24 = vpack.c.bf16 %v1527_v34, %v1495_v5 }
 0x14b   :  { %v1784_v18 = vpack.c.bf16 %v1656_v22, %v1624_v39  ;;  %v1786_v36 = vpack.c.bf16 %v1658_v43, %v1626_v40  ;;  %v1751_v39 = vpack.c.bf16 %v1591_v0, %v1559_v61  ;;  %v1720_v40 = vpack.c.bf16 %v1528_v63, %v1496_v44 }
 0x14c   :  { %v3972_v57 = vpop.f32.mrf.mxu0  ;;  %v3974_v59 = vpop.f32.mrf.mxu1  ;;  %v1721_v30 = vpack.c.bf16 %v1529_v13, %v1497_v25  ;;  %v3138_v34 = vcombine.low %v3970_v52, %v3970_v52  ;;  %v4048_v13 = vld [vmem:[%s4492_s0 + $0xc8] sm:$0xff] }
 0x14d   :  { %2163 = vmatprep.subr.bf16.mxu0 %v1784_v18  ;;  %2203 = vmatprep.subr.bf16.mxu1 %v1786_v36 }
 0x14e   :  { %2108 = vmatmul.mubr.bf16.vlgmr.msra.gmra.mxu0 %v3132_v54  ;;  %2148 = vmatmul.mubr.bf16.vlgmr.msra.gmra.mxu1 %v3134_v14  ;;  %v3980_v60 = vpop.f32.mrf.mxu0  ;;  %v3982_v56 = vpop.f32.mrf.mxu1  ;;  %v1432_v54 = vmax.f32 %v3894_v9, 0.0  ;;  %v1434_v14 = vmax.f32 %v3896_v2, 0.0  ;;  %v1463_v9 = vmax.f32 %v3902_v8, 0.0  ;;  %v1465_v2 = vmax.f32 %v3904_v1, 0.0 }
 0x14f   :  { %2164 = vmatpush1.bf16.xpose.msra.mxu0 %v1783_v53  ;;  %2204 = vmatpush1.bf16.xpose.msra.mxu1 %v1785_v11  ;;  %v1433_v53 = vmax.f32 %v3883_v37, 0.0 }
 0x150   :  { %2165 = vmatprep.subr.bf16.mxu0 %v1752_v29  ;;  %2205 = vmatprep.subr.bf16.mxu1 %v1754_v6  ;;  %v3984_v12 = vpop.f32.mrf.mxu0  ;;  %v3986_v38 = vpop.f32.mrf.mxu1  ;;  %v1688_v18 = vpack.c.bf16 %v1464_v19, %v1432_v54  ;;  %v1690_v26 = vpack.c.bf16 %v1466_v50, %v1434_v14 }
 0x151   :  { %2187 = vmatprep.mubr.bf16.mxu0 %v3137_v17  ;;  %2227 = vmatprep.mubr.bf16.mxu1 %v3139_v20  ;;  %v1431_v17 = vmax.f32 %v3881_v48, 0.0  ;;  %v1689_v6 = vpack.c.bf16 %v1465_v2, %v1433_v53  ;;  %v4035_v48 = vld [vmem:[%s4492_s0 + $0xc0] sm:$0xff] }
 0x152   :  { %v3992_v7 = vpop.f32.mrf.mxu0  ;;  %v3994_v33 = vpop.f32.mrf.mxu1 }
 0x153   :  { %v1687_v29 = vpack.c.bf16 %v1463_v9, %v1431_v17 }
 0x154   :  { %v4000_v45 = vpop.f32.mrf.mxu0  ;;  %v4002_v21 = vpop.f32.mrf.mxu1 }
 0x156   :  { %v4004_v16 = vpop.f32.mrf.mxu0  ;;  %v4006_v46 = vpop.f32.mrf.mxu1 }
 0x157   :  { %2166 = vmatpush1.bf16.xpose.msra.mxu0 %v1751_v39  ;;  %2206 = vmatpush1.bf16.xpose.msra.mxu1 %v1753_v51 }
 0x158   :  { %2167 = vmatprep.subr.bf16.mxu0 %v1720_v40  ;;  %2207 = vmatprep.subr.bf16.mxu1 %v1722_v55  ;;  %v4008_v32 = vpop.f32.mrf.mxu0  ;;  %v4010_v23 = vpop.f32.mrf.mxu1  ;;  %v3136_v55 = vcombine.low %v3957_v47, %v3957_v47  ;;  %v3141_v47 = vcombine.high %v4035_v48, %v4035_v48 }
 0x159   :  { %v1532_v17 = vmax.f32 %v4008_v32, 0.0  ;;  %v1534_v53 = vmax.f32 %v4010_v23, 0.0 }
 0x15a   :  { %v4016_v22 = vpop.f32.mrf.mxu0  ;;  %v4018_v43 = vpop.f32.mrf.mxu1 }
 0x15c   :  { %v891_v42 = vpop.f32.mrf.mxu0  ;;  %v964_v31 = vpop.f32.mrf.mxu1 }
 0x15d   :  { %v1564_v54 = vmax.f32 %v891_v42, 0.0  ;;  %v1566_v14 = vmax.f32 %v964_v31, 0.0 }
 0x15e   :  { %v4024_v36 = vpop.f32.mrf.mxu0  ;;  %v4026_v27 = vpop.f32.mrf.mxu1 }
 0x15f   :  { %2168 = vmatpush1.bf16.xpose.msra.mxu0 %v1719_v24  ;;  %2208 = vmatpush1.bf16.xpose.msra.mxu1 %v1721_v30 }
 0x160   :  { %2169 = vmatprep.subr.bf16.mxu0 %v1688_v18  ;;  %2209 = vmatprep.subr.bf16.mxu1 %v1690_v26  ;;  %v895_v4 = vpop.f32.mrf.mxu0  ;;  %v968_v15 = vpop.f32.mrf.mxu1  ;;  %v3143_v26 = vcombine.high %v4048_v13, %v4048_v13 }
 0x161   :  { %v1596_v37 = vmax.f32 %v895_v4, 0.0  ;;  %v1598_v39 = vmax.f32 %v968_v15, 0.0 }
 0x162   :  { %v899_v3 = vpop.f32.mrf.mxu0  ;;  %v972_v58 = vpop.f32.mrf.mxu1 }
 0x163   :  { %v1627_v19 = vmax.f32 %v899_v3, 0.0  ;;  %v1629_v50 = vmax.f32 %v972_v58, 0.0  ;;  %v1756_v4 = vpack.c.bf16 %v1596_v37, %v1564_v54  ;;  %v1758_v15 = vpack.c.bf16 %v1598_v39, %v1566_v14 }
 0x164   :  { %v901_v11 = vpop.f32.mrf.mxu0  ;;  %v974_v20 = vpop.f32.mrf.mxu1  ;;  %v1595_v3 = vmax.f32 %v4024_v36, 0.0  ;;  %v1597_v58 = vmax.f32 %v4026_v27, 0.0  ;;  %v1502_v36 = vmax.f32 %v4002_v21, 0.0  ;;  %v1531_v21 = vmax.f32 %v4004_v16, 0.0 }
 0x165   :  { %v1628_v63 = vmax.f32 %v901_v11, 0.0  ;;  %v1630_v49 = vmax.f32 %v974_v20, 0.0  ;;  %v1499_v37 = vmax.f32 %v3992_v7, 0.0  ;;  %v1501_v39 = vmax.f32 %v3994_v33, 0.0 }
 0x166   :  { %v903_v0 = vpop.f32.mrf.mxu0  ;;  %v976_v35 = vpop.f32.mrf.mxu1  ;;  %v1726_v23 = vpack.c.bf16 %v1534_v53, %v1502_v36 }
 0x167   :  { %2170 = vmatpush1.bf16.xpose.msra.mxu0 %v1687_v29  ;;  %2210 = vmatpush1.bf16.xpose.msra.mxu1 %v1689_v6  ;;  %v1659_v62 = vmax.f32 %v903_v0, 0.0  ;;  %v1661_v1 = vmax.f32 %v976_v35, 0.0  ;;  %v1563_v29 = vmax.f32 %v4016_v22, 0.0  ;;  %v1565_v6 = vmax.f32 %v4018_v43, 0.0 }
 0x168   :  { %v905_v61 = vpop.f32.mrf.mxu0  ;;  %v978_v8 = vpop.f32.mrf.mxu1  ;;  %v1500_v0 = vmax.f32 %v4000_v45, 0.0  ;;  %v1533_v43 = vmax.f32 %v4006_v46, 0.0 }
 0x169   :  { %v1660_v44 = vmax.f32 %v905_v61, 0.0  ;;  %v1662_v41 = vmax.f32 %v978_v8, 0.0  ;;  %v1787_v18 = vpack.c.bf16 %v1659_v62, %v1627_v19  ;;  %v1789_v52 = vpack.c.bf16 %v1661_v1, %v1629_v50 }
 0x16a   :  { %v4037_v51 = vpop.f32.mrf.mxu0  ;;  %v4039_v40 = vpop.f32.mrf.mxu1  ;;  %v1757_v32 = vpack.c.bf16 %v1597_v58, %v1565_v6  ;;  %v1468_v62 = vmax.f32 %v3984_v12, 0.0  ;;  %v1470_v1 = vmax.f32 %v3986_v38, 0.0  ;;  %v1723_v50 = vpack.c.bf16 %v1531_v21, %v1499_v37 }
 0x16b   :  { %v1788_v5 = vpack.c.bf16 %v1660_v44, %v1628_v63  ;;  %v1790_v25 = vpack.c.bf16 %v1662_v41, %v1630_v49  ;;  %v1755_v63 = vpack.c.bf16 %v1595_v3, %v1563_v29  ;;  %v1724_v49 = vpack.c.bf16 %v1532_v17, %v1500_v0 }
 0x16c   :  { %v4050_v24 = vpop.f32.mrf.mxu0  ;;  %v4052_v30 = vpop.f32.mrf.mxu1  ;;  %v1725_v46 = vpack.c.bf16 %v1533_v43, %v1501_v39  ;;  %v3142_v21 = vcombine.low %v4048_v13, %v4048_v13  ;;  %v4126_v43 = vld [vmem:[%s4492_s0 + $0xd8] sm:$0xff] }
 0x16d   :  { %2243 = vmatprep.subr.bf16.mxu0 %v1788_v5  ;;  %2283 = vmatprep.subr.bf16.mxu1 %v1790_v25 }
 0x16e   :  { %2188 = vmatmul.mubr.bf16.vlgmr.msra.gmra.mxu0 %v3136_v55  ;;  %2228 = vmatmul.mubr.bf16.vlgmr.msra.gmra.mxu1 %v3138_v34  ;;  %v4058_v42 = vpop.f32.mrf.mxu0  ;;  %v4060_v31 = vpop.f32.mrf.mxu1  ;;  %v1436_v55 = vmax.f32 %v3972_v57, 0.0  ;;  %v1438_v34 = vmax.f32 %v3974_v59, 0.0  ;;  %v1467_v57 = vmax.f32 %v3980_v60, 0.0  ;;  %v1469_v59 = vmax.f32 %v3982_v56, 0.0 }
 0x16f   :  { %2244 = vmatpush1.bf16.xpose.msra.mxu0 %v1787_v18  ;;  %2284 = vmatpush1.bf16.xpose.msra.mxu1 %v1789_v52  ;;  %v1437_v18 = vmax.f32 %v3961_v28, 0.0 }
 0x170   :  { %2245 = vmatprep.subr.bf16.mxu0 %v1756_v4  ;;  %2285 = vmatprep.subr.bf16.mxu1 %v1758_v15  ;;  %v4062_v9 = vpop.f32.mrf.mxu0  ;;  %v4064_v2 = vpop.f32.mrf.mxu1  ;;  %v1692_v5 = vpack.c.bf16 %v1468_v62, %v1436_v55  ;;  %v1694_v12 = vpack.c.bf16 %v1470_v1, %v1438_v34 }
 0x171   :  { %2267 = vmatprep.mubr.bf16.mxu0 %v3141_v47  ;;  %2307 = vmatprep.mubr.bf16.mxu1 %v3143_v26  ;;  %v1435_v47 = vmax.f32 %v3959_v10, 0.0  ;;  %v1693_v15 = vpack.c.bf16 %v1469_v59, %v1437_v18  ;;  %v4113_v10 = vld [vmem:[%s4492_s0 + $0xd0] sm:$0xff] }
 0x172   :  { %v4070_v11 = vpop.f32.mrf.mxu0  ;;  %v4072_v20 = vpop.f32.mrf.mxu1 }
 0x173   :  { %v1691_v4 = vpack.c.bf16 %v1467_v57, %v1435_v47 }
 0x174   :  { %v4078_v35 = vpop.f32.mrf.mxu0  ;;  %v4080_v27 = vpop.f32.mrf.mxu1 }
 0x176   :  { %v4082_v61 = vpop.f32.mrf.mxu0  ;;  %v4084_v8 = vpop.f32.mrf.mxu1 }
 0x177   :  { %2246 = vmatpush1.bf16.xpose.msra.mxu0 %v1755_v63  ;;  %2286 = vmatpush1.bf16.xpose.msra.mxu1 %v1757_v32 }
 0x178   :  { %2247 = vmatprep.subr.bf16.mxu0 %v1724_v49  ;;  %2287 = vmatprep.subr.bf16.mxu1 %v1726_v23  ;;  %v4086_v22 = vpop.f32.mrf.mxu0  ;;  %v4088_v45 = vpop.f32.mrf.mxu1  ;;  %v3140_v23 = vcombine.low %v4035_v48, %v4035_v48  ;;  %v3145_v48 = vcombine.high %v4113_v10, %v4113_v10 }
 0x179   :  { %v1536_v47 = vmax.f32 %v4086_v22, 0.0  ;;  %v1538_v18 = vmax.f32 %v4088_v45, 0.0 }
 0x17a   :  { %v4094_v44 = vpop.f32.mrf.mxu0  ;;  %v4096_v41 = vpop.f32.mrf.mxu1 }
 0x17c   :  { %v1037_v19 = vpop.f32.mrf.mxu0  ;;  %v1110_v16 = vpop.f32.mrf.mxu1 }
 0x17d   :  { %v1568_v55 = vmax.f32 %v1037_v19, 0.0  ;;  %v1570_v34 = vmax.f32 %v1110_v16, 0.0 }
 0x17e   :  { %v4102_v25 = vpop.f32.mrf.mxu0  ;;  %v4104_v38 = vpop.f32.mrf.mxu1 }
 0x17f   :  { %2248 = vmatpush1.bf16.xpose.msra.mxu0 %v1723_v50  ;;  %2288 = vmatpush1.bf16.xpose.msra.mxu1 %v1725_v46 }
 0x180   :  { %2249 = vmatprep.subr.bf16.mxu0 %v1692_v5  ;;  %2289 = vmatprep.subr.bf16.mxu1 %v1694_v12  ;;  %v1041_v7 = vpop.f32.mrf.mxu0  ;;  %v1114_v33 = vpop.f32.mrf.mxu1  ;;  %v3147_v12 = vcombine.high %v4126_v43, %v4126_v43 }
 0x181   :  { %v1600_v28 = vmax.f32 %v1041_v7, 0.0  ;;  %v1602_v63 = vmax.f32 %v1114_v33, 0.0 }
 0x182   :  { %v1045_v54 = vpop.f32.mrf.mxu0  ;;  %v1118_v14 = vpop.f32.mrf.mxu1 }
 0x183   :  { %v1631_v62 = vmax.f32 %v1045_v54, 0.0  ;;  %v1633_v1 = vmax.f32 %v1118_v14, 0.0  ;;  %v1760_v7 = vpack.c.bf16 %v1600_v28, %v1568_v55  ;;  %v1762_v33 = vpack.c.bf16 %v1602_v63, %v1570_v34 }
 0x184   :  { %v1047_v52 = vpop.f32.mrf.mxu0  ;;  %v1120_v26 = vpop.f32.mrf.mxu1  ;;  %v1599_v54 = vmax.f32 %v4102_v25, 0.0  ;;  %v1601_v14 = vmax.f32 %v4104_v38, 0.0  ;;  %v1506_v25 = vmax.f32 %v4080_v27, 0.0  ;;  %v1535_v27 = vmax.f32 %v4082_v61, 0.0 }
 0x185   :  { %v1632_v17 = vmax.f32 %v1047_v52, 0.0  ;;  %v1634_v53 = vmax.f32 %v1120_v26, 0.0  ;;  %v1503_v28 = vmax.f32 %v4070_v11, 0.0  ;;  %v1505_v63 = vmax.f32 %v4072_v20, 0.0 }
 0x186   :  { %v1049_v3 = vpop.f32.mrf.mxu0  ;;  %v1122_v58 = vpop.f32.mrf.mxu1  ;;  %v1730_v45 = vpack.c.bf16 %v1538_v18, %v1506_v25 }
 0x187   :  { %2250 = vmatpush1.bf16.xpose.msra.mxu0 %v1691_v4  ;;  %2290 = vmatpush1.bf16.xpose.msra.mxu1 %v1693_v15  ;;  %v1663_v6 = vmax.f32 %v1049_v3, 0.0  ;;  %v1665_v56 = vmax.f32 %v1122_v58, 0.0  ;;  %v1567_v4 = vmax.f32 %v4094_v44, 0.0  ;;  %v1569_v15 = vmax.f32 %v4096_v41, 0.0 }
 0x188   :  { %v1051_v29 = vpop.f32.mrf.mxu0  ;;  %v1124_v60 = vpop.f32.mrf.mxu1  ;;  %v1504_v3 = vmax.f32 %v4078_v35, 0.0  ;;  %v1537_v41 = vmax.f32 %v4084_v8, 0.0 }
 0x189   :  { %v1664_v0 = vmax.f32 %v1051_v29, 0.0  ;;  %v1666_v36 = vmax.f32 %v1124_v60, 0.0  ;;  %v1791_v5 = vpack.c.bf16 %v1663_v6, %v1631_v62  ;;  %v1793_v13 = vpack.c.bf16 %v1665_v56, %v1633_v1 }
 0x18a   :  { %v4115_v32 = vpop.f32.mrf.mxu0  ;;  %v4117_v49 = vpop.f32.mrf.mxu1  ;;  %v1761_v22 = vpack.c.bf16 %v1601_v14, %v1569_v15  ;;  %v1472_v6 = vmax.f32 %v4062_v9, 0.0  ;;  %v1474_v56 = vmax.f32 %v4064_v2, 0.0  ;;  %v1727_v1 = vpack.c.bf16 %v1535_v27, %v1503_v28 }
 0x18b   :  { %v1792_v37 = vpack.c.bf16 %v1664_v0, %v1632_v17  ;;  %v1794_v39 = vpack.c.bf16 %v1666_v36, %v1634_v53  ;;  %v1759_v17 = vpack.c.bf16 %v1599_v54, %v1567_v4  ;;  %v1728_v53 = vpack.c.bf16 %v1536_v47, %v1504_v3 }
 0x18c   :  { %v4128_v50 = vpop.f32.mrf.mxu0  ;;  %v4130_v46 = vpop.f32.mrf.mxu1  ;;  %v1729_v8 = vpack.c.bf16 %v1537_v41, %v1505_v63  ;;  %v3146_v27 = vcombine.low %v4126_v43, %v4126_v43  ;;  %v4204_v41 = vld [vmem:[%s4492_s0 + $0xe8] sm:$0xff] }
 0x18d   :  { %2323 = vmatprep.subr.bf16.mxu0 %v1792_v37  ;;  %2363 = vmatprep.subr.bf16.mxu1 %v1794_v39 }
 0x18e   :  { %2268 = vmatmul.mubr.bf16.vlgmr.msra.gmra.mxu0 %v3140_v23  ;;  %2308 = vmatmul.mubr.bf16.vlgmr.msra.gmra.mxu1 %v3142_v21  ;;  %v4136_v19 = vpop.f32.mrf.mxu0  ;;  %v4138_v16 = vpop.f32.mrf.mxu1  ;;  %v1440_v23 = vmax.f32 %v4050_v24, 0.0  ;;  %v1442_v21 = vmax.f32 %v4052_v30, 0.0  ;;  %v1471_v24 = vmax.f32 %v4058_v42, 0.0  ;;  %v1473_v30 = vmax.f32 %v4060_v31, 0.0 }
 0x18f   :  { %2324 = vmatpush1.bf16.xpose.msra.mxu0 %v1791_v5  ;;  %2364 = vmatpush1.bf16.xpose.msra.mxu1 %v1793_v13  ;;  %v1441_v5 = vmax.f32 %v4039_v40, 0.0 }
 0x190   :  { %2325 = vmatprep.subr.bf16.mxu0 %v1760_v7  ;;  %2365 = vmatprep.subr.bf16.mxu1 %v1762_v33  ;;  %v4140_v57 = vpop.f32.mrf.mxu0  ;;  %v4142_v59 = vpop.f32.mrf.mxu1  ;;  %v1696_v37 = vpack.c.bf16 %v1472_v6, %v1440_v23  ;;  %v1698_v9 = vpack.c.bf16 %v1474_v56, %v1442_v21 }
 0x191   :  { %2347 = vmatprep.mubr.bf16.mxu0 %v3145_v48  ;;  %2387 = vmatprep.mubr.bf16.mxu1 %v3147_v12  ;;  %v1439_v48 = vmax.f32 %v4037_v51, 0.0  ;;  %v1697_v33 = vpack.c.bf16 %v1473_v30, %v1441_v5  ;;  %v4191_v51 = vld [vmem:[%s4492_s0 + $0xe0] sm:$0xff] }
 0x192   :  { %v4148_v52 = vpop.f32.mrf.mxu0  ;;  %v4150_v26 = vpop.f32.mrf.mxu1 }
 0x193   :  { %v1695_v7 = vpack.c.bf16 %v1471_v24, %v1439_v48 }
 0x194   :  { %v4156_v58 = vpop.f32.mrf.mxu0  ;;  %v4158_v38 = vpop.f32.mrf.mxu1 }
 0x196   :  { %v4160_v29 = vpop.f32.mrf.mxu0  ;;  %v4162_v60 = vpop.f32.mrf.mxu1 }
 0x197   :  { %2326 = vmatpush1.bf16.xpose.msra.mxu0 %v1759_v17  ;;  %2366 = vmatpush1.bf16.xpose.msra.mxu1 %v1761_v22 }
 0x198   :  { %2327 = vmatprep.subr.bf16.mxu0 %v1728_v53  ;;  %2367 = vmatprep.subr.bf16.mxu1 %v1730_v45  ;;  %v4164_v44 = vpop.f32.mrf.mxu0  ;;  %v4166_v35 = vpop.f32.mrf.mxu1  ;;  %v3144_v45 = vcombine.low %v4113_v10, %v4113_v10  ;;  %v3149_v10 = vcombine.high %v4191_v51, %v4191_v51 }
 0x199   :  { %v1540_v48 = vmax.f32 %v4164_v44, 0.0  ;;  %v1542_v5 = vmax.f32 %v4166_v35, 0.0 }
 0x19a   :  { %v4172_v0 = vpop.f32.mrf.mxu0  ;;  %v4174_v36 = vpop.f32.mrf.mxu1 }
 0x19c   :  { %v1183_v62 = vpop.f32.mrf.mxu0  ;;  %v1256_v61 = vpop.f32.mrf.mxu1 }
 0x19d   :  { %v1572_v23 = vmax.f32 %v1183_v62, 0.0  ;;  %v1574_v21 = vmax.f32 %v1256_v61, 0.0 }
 0x19e   :  { %v4180_v39 = vpop.f32.mrf.mxu0  ;;  %v4182_v2 = vpop.f32.mrf.mxu1 }
 0x19f   :  { %2328 = vmatpush1.bf16.xpose.msra.mxu0 %v1727_v1  ;;  %2368 = vmatpush1.bf16.xpose.msra.mxu1 %v1729_v8 }
 0x1a0   :  { %2329 = vmatprep.subr.bf16.mxu0 %v1696_v37  ;;  %2369 = vmatprep.subr.bf16.mxu1 %v1698_v9  ;;  %v1187_v11 = vpop.f32.mrf.mxu0  ;;  %v1260_v20 = vpop.f32.mrf.mxu1  ;;  %v3151_v9 = vcombine.high %v4204_v41, %v4204_v41 }
 0x1a1   :  { %v1604_v40 = vmax.f32 %v1187_v11, 0.0  ;;  %v1606_v17 = vmax.f32 %v1260_v20, 0.0 }
 0x1a2   :  { %v1191_v55 = vpop.f32.mrf.mxu0  ;;  %v1264_v34 = vpop.f32.mrf.mxu1 }
 0x1a3   :  { %v1635_v6 = vmax.f32 %v1191_v55, 0.0  ;;  %v1637_v56 = vmax.f32 %v1264_v34, 0.0  ;;  %v1764_v11 = vpack.c.bf16 %v1604_v40, %v1572_v23  ;;  %v1766_v20 = vpack.c.bf16 %v1606_v17, %v1574_v21 }
 0x1a4   :  { %v1193_v13 = vpop.f32.mrf.mxu0  ;;  %v1266_v12 = vpop.f32.mrf.mxu1  ;;  %v1603_v55 = vmax.f32 %v4180_v39, 0.0  ;;  %v1605_v34 = vmax.f32 %v4182_v2, 0.0  ;;  %v1510_v39 = vmax.f32 %v4158_v38, 0.0  ;;  %v1539_v38 = vmax.f32 %v4160_v29, 0.0 }
 0x1a5   :  { %v1636_v47 = vmax.f32 %v1193_v13, 0.0  ;;  %v1638_v18 = vmax.f32 %v1266_v12, 0.0  ;;  %v1507_v40 = vmax.f32 %v4148_v52, 0.0  ;;  %v1509_v17 = vmax.f32 %v4150_v26, 0.0 }
 0x1a6   :  { %v1195_v54 = vpop.f32.mrf.mxu0  ;;  %v1268_v14 = vpop.f32.mrf.mxu1  ;;  %v1734_v35 = vpack.c.bf16 %v1542_v5, %v1510_v39 }
 0x1a7   :  { %2330 = vmatpush1.bf16.xpose.msra.mxu0 %v1695_v7  ;;  %2370 = vmatpush1.bf16.xpose.msra.mxu1 %v1697_v33  ;;  %v1667_v15 = vmax.f32 %v1195_v54, 0.0  ;;  %v1669_v31 = vmax.f32 %v1268_v14, 0.0  ;;  %v1571_v7 = vmax.f32 %v4172_v0, 0.0  ;;  %v1573_v33 = vmax.f32 %v4174_v36, 0.0 }
 0x1a8   :  { %v1197_v4 = vpop.f32.mrf.mxu0  ;;  %v1270_v42 = vpop.f32.mrf.mxu1  ;;  %v1508_v54 = vmax.f32 %v4156_v58, 0.0  ;;  %v1541_v36 = vmax.f32 %v4162_v60, 0.0 }
 0x1a9   :  { %v1668_v3 = vmax.f32 %v1197_v4, 0.0  ;;  %v1670_v25 = vmax.f32 %v1270_v42, 0.0  ;;  %v1795_v37 = vpack.c.bf16 %v1667_v15, %v1635_v6  ;;  %v1797_v43 = vpack.c.bf16 %v1669_v31, %v1637_v56 }
 0x1aa   :  { %v4193_v22 = vpop.f32.mrf.mxu0  ;;  %v4195_v53 = vpop.f32.mrf.mxu1  ;;  %v1765_v44 = vpack.c.bf16 %v1605_v34, %v1573_v33  ;;  %v1476_v15 = vmax.f32 %v4140_v57, 0.0  ;;  %v1478_v31 = vmax.f32 %v4142_v59, 0.0  ;;  %v1731_v56 = vpack.c.bf16 %v1539_v38, %v1507_v40 }
 0x1ab   :  { %v1796_v28 = vpack.c.bf16 %v1668_v3, %v1636_v47  ;;  %v1798_v63 = vpack.c.bf16 %v1670_v25, %v1638_v18  ;;  %v1763_v47 = vpack.c.bf16 %v1603_v55, %v1571_v7  ;;  %v1732_v18 = vpack.c.bf16 %v1540_v48, %v1508_v54 }
 0x1ac   :  { %v4206_v1 = vpop.f32.mrf.mxu0  ;;  %v4208_v8 = vpop.f32.mrf.mxu1  ;;  %v1733_v60 = vpack.c.bf16 %v1541_v36, %v1509_v17 }
 0x1ad   :  { %2403 = vmatprep.subr.bf16.mxu0 %v1796_v28  ;;  %2443 = vmatprep.subr.bf16.mxu1 %v1798_v63 }
 0x1ae   :  { %2348 = vmatmul.mubr.bf16.vlgmr.msra.gmra.mxu0 %v3144_v45  ;;  %2388 = vmatmul.mubr.bf16.vlgmr.msra.gmra.mxu1 %v3146_v27  ;;  %v4214_v62 = vpop.f32.mrf.mxu0  ;;  %v4216_v61 = vpop.f32.mrf.mxu1  ;;  %v1444_v45 = vmax.f32 %v4128_v50, 0.0  ;;  %v1446_v27 = vmax.f32 %v4130_v46, 0.0  ;;  %v1475_v50 = vmax.f32 %v4136_v19, 0.0  ;;  %v1477_v46 = vmax.f32 %v4138_v16, 0.0 }
 0x1af   :  { %2404 = vmatpush1.bf16.xpose.msra.mxu0 %v1795_v37  ;;  %2444 = vmatpush1.bf16.xpose.msra.mxu1 %v1797_v43  ;;  %v1445_v37 = vmax.f32 %v4117_v49, 0.0 }
 0x1b0   :  { %2405 = vmatprep.subr.bf16.mxu0 %v1764_v11  ;;  %2445 = vmatprep.subr.bf16.mxu1 %v1766_v20  ;;  %v4218_v24 = vpop.f32.mrf.mxu0  ;;  %v4220_v30 = vpop.f32.mrf.mxu1  ;;  %v1700_v28 = vpack.c.bf16 %v1476_v15, %v1444_v45  ;;  %v1702_v57 = vpack.c.bf16 %v1478_v31, %v1446_v27 }
 0x1b1   :  { %2427 = vmatprep.mubr.bf16.mxu0 %v3149_v10  ;;  %2467 = vmatprep.mubr.bf16.mxu1 %v3151_v9  ;;  %v1443_v10 = vmax.f32 %v4115_v32, 0.0  ;;  %v1701_v20 = vpack.c.bf16 %v1477_v46, %v1445_v37  ;;  %v4269_v32 = vld [vmem:[%s4492_s0 + $0xf0] sm:$0xff] }
 0x1b2   :  { %v4226_v13 = vpop.f32.mrf.mxu0  ;;  %v4228_v12 = vpop.f32.mrf.mxu1  ;;  %v3153_v45 = vcombine.high %v4269_v32, %v4269_v32 }
 0x1b3   :  { %v1699_v11 = vpack.c.bf16 %v1475_v50, %v1443_v10 }
 0x1b4   :  { %v4234_v14 = vpop.f32.mrf.mxu0  ;;  %v4236_v2 = vpop.f32.mrf.mxu1 }
 0x1b6   :  { %v4238_v4 = vpop.f32.mrf.mxu0  ;;  %v4240_v42 = vpop.f32.mrf.mxu1 }
 0x1b7   :  { %2406 = vmatpush1.bf16.xpose.msra.mxu0 %v1763_v47  ;;  %2446 = vmatpush1.bf16.xpose.msra.mxu1 %v1765_v44  ;;  %v3148_v44 = vcombine.low %v4191_v51, %v4191_v51 }
 0x1b8   :  { %2407 = vmatprep.subr.bf16.mxu0 %v1732_v18  ;;  %2447 = vmatprep.subr.bf16.mxu1 %v1734_v35  ;;  %v4242_v0 = vpop.f32.mrf.mxu0  ;;  %v4244_v58 = vpop.f32.mrf.mxu1  ;;  %v3150_v18 = vcombine.low %v4204_v41, %v4204_v41  ;;  %v4278_v35 = vld [vmem:[%s4492_s0 + $0xf8] sm:$0xff] }
 0x1b9   :  { %v3155_v41 = vcombine.high %v4278_v35, %v4278_v35  ;;  %v1546_v10 = vmax.f32 %v4244_v58, 0.0  ;;  %v1545_v58 = vmax.f32 %v4240_v42, 0.0  ;;  %v3154_v42 = vcombine.low %v4278_v35, %v4278_v35 }
 0x1ba   :  { %v4250_v3 = vpop.f32.mrf.mxu0  ;;  %v4252_v25 = vpop.f32.mrf.mxu1 }
 0x1bb   :  { %v1575_v37 = vmax.f32 %v4250_v3, 0.0  ;;  %v1480_v3 = vmax.f32 %v4218_v24, 0.0  ;;  %v1479_v24 = vmax.f32 %v4214_v62, 0.0 }
 0x1bc   :  { %v1329_v6 = vpop.f32.mrf.mxu0  ;;  %v1402_v29 = vpop.f32.mrf.mxu1 }
 0x1bd   :  { %v1576_v40 = vmax.f32 %v1329_v6, 0.0  ;;  %v1578_v17 = vmax.f32 %v1402_v29, 0.0 }
 0x1be   :  { %v4258_v63 = vpop.f32.mrf.mxu0  ;;  %v4260_v59 = vpop.f32.mrf.mxu1 }
 0x1bf   :  { %2408 = vmatpush1.bf16.xpose.msra.mxu0 %v1731_v56  ;;  %2448 = vmatpush1.bf16.xpose.msra.mxu1 %v1733_v60  ;;  %v1609_v50 = vmax.f32 %v4260_v59, 0.0 }
 0x1c0   :  { %2409 = vmatprep.subr.bf16.mxu0 %v1700_v28  ;;  %2449 = vmatprep.subr.bf16.mxu1 %v1702_v57  ;;  %v1333_v52 = vpop.f32.mrf.mxu0  ;;  %v1406_v26 = vpop.f32.mrf.mxu1 }
 0x1c1   :  { %v1608_v49 = vmax.f32 %v1333_v52, 0.0  ;;  %v1610_v47 = vmax.f32 %v1406_v26, 0.0  ;;  %v1607_v26 = vmax.f32 %v4258_v63, 0.0  ;;  %v1514_v63 = vmax.f32 %v4236_v2, 0.0 }
 0x1c2   :  { %v1337_v23 = vpop.f32.mrf.mxu0  ;;  %v1410_v21 = vpop.f32.mrf.mxu1  ;;  %v1513_v2 = vmax.f32 %v4228_v12, 0.0  ;;  %v1449_v12 = vmax.f32 %v4195_v53, 0.0 }
 0x1c3   :  { %v1639_v38 = vmax.f32 %v1337_v23, 0.0  ;;  %v1641_v36 = vmax.f32 %v1410_v21, 0.0  ;;  %v1768_v28 = vpack.c.bf16 %v1608_v49, %v1576_v40  ;;  %v1770_v57 = vpack.c.bf16 %v1610_v47, %v1578_v17 }
 0x1c4   :  { %v1339_v43 = vpop.f32.mrf.mxu0  ;;  %v1412_v9 = vpop.f32.mrf.mxu1  ;;  %v1544_v21 = vmax.f32 %v4242_v0, 0.0  ;;  %v1543_v0 = vmax.f32 %v4238_v4, 0.0 }
 0x1c5   :  { %v1640_v48 = vmax.f32 %v1339_v43, 0.0  ;;  %v1642_v5 = vmax.f32 %v1412_v9, 0.0  ;;  %v1577_v43 = vmax.f32 %v4252_v25, 0.0  ;;  %v1482_v25 = vmax.f32 %v4220_v30, 0.0 }
 0x1c6   :  { %v1341_v55 = vpop.f32.mrf.mxu0  ;;  %v1414_v34 = vpop.f32.mrf.mxu1  ;;  %v1481_v30 = vmax.f32 %v4216_v61, 0.0 }
 0x1c7   :  { %2410 = vmatpush1.bf16.xpose.msra.mxu0 %v1699_v11  ;;  %2450 = vmatpush1.bf16.xpose.msra.mxu1 %v1701_v20  ;;  %v1671_v33 = vmax.f32 %v1341_v55, 0.0  ;;  %v1673_v16 = vmax.f32 %v1414_v34, 0.0  ;;  %v1512_v20 = vmax.f32 %v4234_v14, 0.0  ;;  %v1767_v55 = vpack.c.bf16 %v1607_v26, %v1575_v37  ;;  %v2555_v37 = vld [vmem:[%s4493_s1 + $0x40] sm:$0xff] }
 0x1c8   :  { %v1343_v7 = vpop.f32.mrf.mxu0  ;;  %v1416_v19 = vpop.f32.mrf.mxu1  ;;  %v1769_v59 = vpack.c.bf16 %v1609_v50, %v1577_v43  ;;  %v1511_v14 = vmax.f32 %v4226_v13, 0.0  ;;  %v1447_v13 = vmax.f32 %v4193_v22, 0.0 }
 0x1c9   :  { %v1672_v54 = vmax.f32 %v1343_v7, 0.0  ;;  %v1674_v39 = vmax.f32 %v1416_v19, 0.0  ;;  %v1799_v27 = vpack.c.bf16 %v1671_v33, %v1639_v38  ;;  %v1801_v56 = vpack.c.bf16 %v1673_v16, %v1641_v36 }
 0x1ca   :  { %v1736_v34 = vpack.c.bf16 %v1544_v21, %v1512_v20  ;;  %v1450_v7 = vmax.f32 %v4208_v8, 0.0  ;;  %v1735_v19 = vpack.c.bf16 %v1543_v0, %v1511_v14  ;;  %v1737_v33 = vpack.c.bf16 %v1545_v58, %v1513_v2  ;;  %v2653_v0 = vld [vmem:[%s4493_s1 + $0xd0] sm:$0xff]  ;;  %v2652_v58 = vld [vmem:[%s4493_s1 + $0xc8] sm:$0xff] }
 0x1cb   :  { %v1800_v15 = vpack.c.bf16 %v1672_v54, %v1640_v48  ;;  %v1802_v31 = vpack.c.bf16 %v1674_v39, %v1642_v5  ;;  %v1738_v48 = vpack.c.bf16 %v1546_v10, %v1514_v63  ;;  %v1448_v5 = vmax.f32 %v4206_v1, 0.0  ;;  %v2658_v63 = vld [vmem:[%s4493_s1 + $0xf8] sm:$0xff]  ;;  %v2649_v14 = vld [vmem:[%s4493_s1 + $0xb0] sm:$0xff]  ;;  %v2648_v2 = vld [vmem:[%s4493_s1 + $0xa8] sm:$0xff] }
 0x1cc   :  { %v1706_v54 = vpack.c.bf16 %v1482_v25, %v1450_v7  ;;  %v1703_v4 = vpack.c.bf16 %v1479_v24, %v1447_v13  ;;  %v1705_v1 = vpack.c.bf16 %v1481_v30, %v1449_v12  ;;  %v3152_v8 = vcombine.low %v4269_v32, %v4269_v32  ;;  %v2650_v25 = vld [vmem:[%s4493_s1 + $0xb8] sm:$0xff] }
 0x1cd   :  { %v1949_v51 = vpop.f32.mrf.mxu0  ;;  %v1989_v60 = vpop.f32.mrf.mxu1  ;;  %2483 = vmatprep.subr.bf16.mxu0 %v1800_v15  ;;  %2523 = vmatprep.subr.bf16.mxu1 %v1802_v31  ;;  %v1704_v16 = vpack.c.bf16 %v1480_v3, %v1448_v5  ;;  %v2651_v3 = vld [vmem:[%s4493_s1 + $0xc0] sm:$0xff]  ;;  %v2646_v7 = vld [vmem:[%s4493_s1 + $0x98] sm:$0xff] }
 0x1ce   :  { %v1990_v52 = vadd.f32 %v1989_v60, %v1949_v51  ;;  %2428 = vmatmul.mubr.bf16.vlgmr.msra.gmra.mxu0 %v3148_v44  ;;  %2468 = vmatmul.mubr.bf16.vlgmr.msra.gmra.mxu1 %v3150_v18  ;;  %v2562_v51 = vld [vmem:[%s4493_s1 + $0x78] sm:$0xff]  ;;  %v3363_v60 = vmov 0.0   ;;  %v2647_v5 = vld [vmem:[%s4493_s1 + $0xa0] sm:$0xff] }
 0x1cf   :  { %2484 = vmatpush1.bf16.xpose.msra.mxu0 %v1799_v27  ;;  %2524 = vmatpush1.bf16.xpose.msra.mxu1 %v1801_v56  ;;  %v1951_v6 = vpop.f32.mrf.mxu0  ;;  %v1991_v29 = vpop.f32.mrf.mxu1  ;;  %13 = vst [vmem:[%s4494_s2 + $0x8] sm:$0xff] %v3363_v60  ;;  %12 = vst [vmem:[%s4494_s2] sm:$0xff] %v3363_v60 }
 0x1d0   :  { %2485 = vmatprep.subr.bf16.mxu0 %v1768_v28  ;;  %2525 = vmatprep.subr.bf16.mxu1 %v1770_v57  ;;  %v2560_v28 = vld [vmem:[%s4493_s1 + $0x68] sm:$0xff]  ;;  %v2559_v57 = vld [vmem:[%s4493_s1 + $0x60] sm:$0xff]  ;;  %v2557_v6 = vld [vmem:[%s4493_s1 + $0x50] sm:$0xff] }
 0x1d1   :  { %v1952_v46 = vpop.f32.mrf.mxu0  ;;  %v1992_v23 = vpop.f32.mrf.mxu1  ;;  %2507 = vmatprep.mubr.bf16.mxu0 %v3153_v45  ;;  %2547 = vmatprep.mubr.bf16.mxu1 %v3155_v41  ;;  %v2561_v41 = vld [vmem:[%s4493_s1 + $0x70] sm:$0xff] }
 0x1d2   :  { %v2556_v46 = vld [vmem:[%s4493_s1 + $0x48] sm:$0xff] }
 0x1d3   :  { %v1953_v9 = vpop.f32.mrf.mxu0  ;;  %v1993_v11 = vpop.f32.mrf.mxu1 }
 0x1d7   :  { %2486 = vmatpush1.bf16.xpose.msra.mxu0 %v1767_v55  ;;  %2526 = vmatpush1.bf16.xpose.msra.mxu1 %v1769_v59  ;;  %v2657_v55 = vld [vmem:[%s4493_s1 + $0xf0] sm:$0xff]  ;;  %v2656_v59 = vld [vmem:[%s4493_s1 + $0xe8] sm:$0xff] }
 0x1d8   :  { %2487 = vmatprep.subr.bf16.mxu0 %v1736_v34  ;;  %2527 = vmatprep.subr.bf16.mxu1 %v1738_v48  ;;  %v2655_v34 = vld [vmem:[%s4493_s1 + $0xe0] sm:$0xff]  ;;  %v2654_v48 = vld [vmem:[%s4493_s1 + $0xd8] sm:$0xff] }
 0x1df   :  { %2488 = vmatpush1.bf16.xpose.msra.mxu0 %v1735_v19  ;;  %2528 = vmatpush1.bf16.xpose.msra.mxu1 %v1737_v33 }
 0x1e0   :  { %2489 = vmatprep.subr.bf16.mxu0 %v1704_v16  ;;  %2529 = vmatprep.subr.bf16.mxu1 %v1706_v54 }
 0x1e7   :  { %2490 = vmatpush1.bf16.xpose.msra.mxu0 %v1703_v4  ;;  %2530 = vmatpush1.bf16.xpose.msra.mxu1 %v1705_v1 }
 0x1e8   :  { %3202 = vmatprep.subr.mxu0 %v3363_v60  ;;  %3221 = vmatprep.subr.mxu1 %v3363_v60 }
 0x1ee   :  { %v2029_v39 = vpop.f32.mrf.mxu0  ;;  %v2069_v49 = vpop.f32.mrf.mxu1  ;;  %2508 = vmatmul.mubr.bf16.vlgmr.msra.gmra.mxu0 %v3152_v8  ;;  %2548 = vmatmul.mubr.bf16.vlgmr.msra.gmra.mxu1 %v3154_v42 }
 0x1ef   :  { %v2030_v62 = vadd.f32 %v2029_v39, %v1990_v52  ;;  %3203 = vmatpush3.msra.mxu0 %v2562_v51  ;;  %v2558_v52 = vld [vmem:[%s4493_s1 + $0x58] sm:$0xff]  ;;  %3218 = vmatprep.mubr.msk.f32.mxu0 %vm3364_vm3, %v3363_v60 }
 0x1f0   :  { %v2031_v61 = vpop.f32.mrf.mxu0  ;;  %v2071_v47 = vpop.f32.mrf.mxu1  ;;  %3204 = vmatprep.subr.mxu0 %v3363_v60  ;;  %3253 = vmatprep.mubr.msk.f32.mxu1 %vm3364_vm3, %v3363_v60 }
 0x1f1   :  { %v2070_v22 = vadd.f32 %v2069_v49, %v2030_v62  ;;  %3205 = vmatpush3.msra.mxu0 %v2561_v41  ;;  %3222 = vmatpush3.msra.mxu1 %v2658_v63 }
 0x1f2   :  { %v2032_v44 = vpop.f32.mrf.mxu0  ;;  %v2072_v53 = vpop.f32.mrf.mxu1  ;;  %3206 = vmatprep.subr.mxu0 %v3363_v60  ;;  %3223 = vmatprep.subr.mxu1 %v3363_v60 }
 0x1f3   :  { %3207 = vmatpush3.msra.mxu0 %v2560_v28  ;;  %3224 = vmatpush3.msra.mxu1 %v2657_v55 }
 0x1f4   :  { %v2033_v18 = vpop.f32.mrf.mxu0  ;;  %v2073_v38 = vpop.f32.mrf.mxu1  ;;  %3208 = vmatprep.subr.mxu0 %v3363_v60  ;;  %3225 = vmatprep.subr.mxu1 %v3363_v60 }
 0x1f5   :  { %3209 = vmatpush3.msra.mxu0 %v2559_v57  ;;  %3226 = vmatpush3.msra.mxu1 %v2656_v59 }
 0x1f6   :  { %3210 = vmatprep.subr.mxu0 %v3363_v60  ;;  %3227 = vmatprep.subr.mxu1 %v3363_v60 }
 0x1f7   :  { %3211 = vmatpush3.msra.mxu0 %v2558_v52  ;;  %3228 = vmatpush3.msra.mxu1 %v2655_v34  ;;  %v2736_v34 = vld [vmem:[%s4493_s1 + $0x110] sm:$0xff] }
 0x1f8   :  { %3212 = vmatprep.subr.mxu0 %v3363_v60  ;;  %3229 = vmatprep.subr.mxu1 %v3363_v60 }
 0x1f9   :  { %3213 = vmatpush3.msra.mxu0 %v2557_v6  ;;  %3230 = vmatpush3.msra.mxu1 %v2654_v48  ;;  %v2735_v48 = vld [vmem:[%s4493_s1 + $0x108] sm:$0xff] }
 0x1fa   :  { %3214 = vmatprep.subr.mxu0 %v3363_v60  ;;  %3231 = vmatprep.subr.mxu1 %v3363_v60 }
 0x1fb   :  { %3215 = vmatpush3.msra.mxu0 %v2556_v46  ;;  %3232 = vmatpush3.msra.mxu1 %v2653_v0  ;;  %v2644_v46 = vld [vmem:[%s4493_s1 + $0x88] sm:$0xff]  ;;  %v2734_v0 = vld [vmem:[%s4493_s1 + $0x100] sm:$0xff] }
 0x1fc   :  { %3216 = vmatprep.subr.mxu0 %v3363_v60  ;;  %3233 = vmatprep.subr.mxu1 %v3363_v60 }
 0x1fd   :  { %3217 = vmatpush3.msra.mxu0 %v2555_v37  ;;  %3234 = vmatpush3.msra.mxu1 %v2652_v58  ;;  %v2739_v37 = vld [vmem:[%s4493_s1 + $0x128] sm:$0xff]  ;;  %v3158_v58 = vld [vmem:[%s4493_s1 + $0x159] ss:$0 sm:$0xff] }
 0x1fe   :  { %3256 = vmatprep.subr.mxu0 %v3363_v60  ;;  %3235 = vmatprep.subr.mxu1 %v3363_v60 }
 0x1ff   :  { %3236 = vmatpush3.msra.mxu1 %v2651_v3 }
 0x200   :  { %3237 = vmatprep.subr.mxu1 %v3363_v60 }
 0x201   :  { %3238 = vmatpush3.msra.mxu1 %v2650_v25 }
 0x202   :  { %3239 = vmatprep.subr.mxu1 %v3363_v60 }
 0x203   :  { %3240 = vmatpush3.msra.mxu1 %v2649_v14 }
 0x204   :  { %3241 = vmatprep.subr.mxu1 %v3363_v60 }
 0x205   :  { %3242 = vmatpush3.msra.mxu1 %v2648_v2 }
 0x206   :  { %3243 = vmatprep.subr.mxu1 %v3363_v60 }
 0x207   :  { %3244 = vmatpush3.msra.mxu1 %v2647_v5  ;;  %v2828_v5 = vld [vmem:[%s4493_s1 + $0x148] sm:$0xff] }
 0x208   :  { %3245 = vmatprep.subr.mxu1 %v3363_v60 }
 0x209   :  { %3246 = vmatpush3.msra.mxu1 %v2646_v7  ;;  %v2827_v7 = vld [vmem:[%s4493_s1 + $0x140] sm:$0xff] }
 0x20a   :  { %3247 = vmatprep.subr.mxu1 %v3363_v60 }
 0x20e   :  { %v2109_v36 = vpop.f32.mrf.mxu0  ;;  %v2149_v15 = vpop.f32.mrf.mxu1 }
 0x20f   :  { %v2110_v31 = vadd.f32 %v2109_v36, %v2070_v22 }
 0x210   :  { %v2111_v40 = vpop.f32.mrf.mxu0  ;;  %v2151_v32 = vpop.f32.mrf.mxu1 }
 0x211   :  { %v2150_v17 = vadd.f32 %v2149_v15, %v2110_v31 }
 0x212   :  { %v2112_v45 = vpop.f32.mrf.mxu0  ;;  %v2152_v35 = vpop.f32.mrf.mxu1 }
 0x214   :  { %v2113_v27 = vpop.f32.mrf.mxu0  ;;  %v2153_v56 = vpop.f32.mrf.mxu1 }
 0x22e   :  { %v2189_v29 = vpop.f32.mrf.mxu0  ;;  %v2229_v26 = vpop.f32.mrf.mxu1 }
 0x22f   :  { %v2190_v50 = vadd.f32 %v2189_v29, %v2150_v17 }
 0x230   :  { %v2191_v23 = vpop.f32.mrf.mxu0  ;;  %v2231_v21 = vpop.f32.mrf.mxu1 }
 0x231   :  { %v2230_v10 = vadd.f32 %v2229_v26, %v2190_v50  ;;  %v2645_v50 = vld [vmem:[%s4493_s1 + $0x90] sm:$0xff]  ;;  %v2643_v23 = vld [vmem:[%s4493_s1 + $0x80] sm:$0xff]  ;;  %v2741_v21 = vld [vmem:[%s4493_s1 + $0x138] sm:$0xff] }
 0x232   :  { %v2192_v43 = vpop.f32.mrf.mxu0  ;;  %v2232_v9 = vpop.f32.mrf.mxu1  ;;  %3248 = vmatpush3.msra.mxu1 %v2645_v50 }
 0x233   :  { %3249 = vmatprep.subr.mxu1 %v3363_v60  ;;  %v2738_v43 = vld [vmem:[%s4493_s1 + $0x120] sm:$0xff]  ;;  %v2737_v9 = vld [vmem:[%s4493_s1 + $0x118] sm:$0xff] }
 0x234   :  { %v2193_v11 = vpop.f32.mrf.mxu0  ;;  %v2233_v20 = vpop.f32.mrf.mxu1  ;;  %3250 = vmatpush3.msra.mxu1 %v2644_v46 }
 0x235   :  { %3251 = vmatprep.subr.mxu1 %v3363_v60  ;;  %v3156_v11 = vld [vmem:[%s4493_s1 + $0x158] ss:$0 sm:$0xff] }
 0x236   :  { %3252 = vmatpush3.msra.mxu1 %v2643_v23 }
 0x237   :  { %3282 = vmatprep.subr.mxu1 %v3363_v60 }
 0x24e   :  { %v2269_v19 = vpop.f32.mrf.mxu0  ;;  %v2309_v33 = vpop.f32.mrf.mxu1 }
 0x24f   :  { %v2270_v16 = vadd.f32 %v2269_v19, %v2230_v10  ;;  %v2740_v10 = vld [vmem:[%s4493_s1 + $0x130] sm:$0xff] }
 0x250   :  { %v2271_v54 = vpop.f32.mrf.mxu0  ;;  %v2311_v24 = vpop.f32.mrf.mxu1 }
 0x251   :  { %v2310_v30 = vadd.f32 %v2309_v33, %v2270_v16 }
 0x252   :  { %v2272_v13 = vpop.f32.mrf.mxu0  ;;  %v2312_v12 = vpop.f32.mrf.mxu1 }
 0x254   :  { %v2273_v4 = vpop.f32.mrf.mxu0  ;;  %v2313_v1 = vpop.f32.mrf.mxu1 }
 0x26e   :  { %v2349_v8 = vpop.f32.mrf.mxu0  ;;  %v2389_v42 = vpop.f32.mrf.mxu1 }
 0x26f   :  { %v2350_v32 = vadd.f32 %v2349_v8, %v2310_v30  ;;  %v2926_v30 = vld [vmem:[%s4493_s1 + $0x150] sm:$0xff]  ;;  %s3368_s1 = smov 1  }
 0x270   :  { %v2351_v39 = vpop.f32.mrf.mxu0  ;;  %v2391_v49 = vpop.f32.mrf.mxu1 }
 0x271   :  { %v2390_v17 = vadd.f32 %v2389_v42, %v2350_v32 }
 0x272   :  { %v2352_v62 = vpop.f32.mrf.mxu0  ;;  %v2392_v61 = vpop.f32.mrf.mxu1 }
 0x274   :  { %v2353_v47 = vpop.f32.mrf.mxu0  ;;  %v2393_v22 = vpop.f32.mrf.mxu1 }
 0x28e   :  { %v2429_v44 = vpop.f32.mrf.mxu0  ;;  %v2469_v53 = vpop.f32.mrf.mxu1 }
 0x28f   :  { %v2430_v45 = vadd.f32 %v2429_v44, %v2390_v17 }
 0x290   :  { %v2431_v18 = vpop.f32.mrf.mxu0  ;;  %v2471_v38 = vpop.f32.mrf.mxu1 }
 0x291   :  { %v2470_v35 = vadd.f32 %v2469_v53, %v2430_v45 }
 0x292   :  { %v2432_v36 = vpop.f32.mrf.mxu0  ;;  %v2472_v15 = vpop.f32.mrf.mxu1 }
 0x294   :  { %v2433_v31 = vpop.f32.mrf.mxu0  ;;  %v2473_v40 = vpop.f32.mrf.mxu1 }
 0x2ae   :  { %v2509_v27 = vpop.f32.mrf.mxu0  ;;  %v2549_v56 = vpop.f32.mrf.mxu1 }
 0x2af   :  { %v2510_v51 = vadd.f32 %v2509_v27, %v2470_v35 }
 0x2b0   :  { %v2511_v41 = vpop.f32.mrf.mxu0  ;;  %v2551_v28 = vpop.f32.mrf.mxu1 }
 0x2b1   :  { %v2550_v57 = vadd.f32 %v2549_v56, %v2510_v51 }
 0x2b2   :  { %v2512_v52 = vpop.f32.mrf.mxu0  ;;  %v2552_v6 = vpop.f32.mrf.mxu1 }
 0x2b3   :  { %3219 = vmatmul.mubr.msk.f32.vlgmr.msra.gmra.mxu0 %vm2568_vm4, %v2550_v57 }
 0x2b4   :  { %v2513_v29 = vpop.f32.mrf.mxu0  ;;  %v2553_v26 = vpop.f32.mrf.mxu1  ;;  %3272 = vmatprep.mubr.msk.f32.mxu0 %vm3364_vm3, %v3363_v60  ;;  %3257 = vmatpush3.msra.mxu0 %v2741_v21 }
 0x2b5   :  { %3258 = vmatprep.subr.mxu0 %v3363_v60 }
 0x2b6   :  { %3259 = vmatpush3.msra.mxu0 %v2740_v10 }
 0x2b7   :  { %3260 = vmatprep.subr.mxu0 %v3363_v60 }
 0x2b8   :  { %3261 = vmatpush3.msra.mxu0 %v2739_v37 }
 0x2b9   :  { %3262 = vmatprep.subr.mxu0 %v3363_v60 }
 0x2ba   :  { %3263 = vmatpush3.msra.mxu0 %v2738_v43 }
 0x2bb   :  { %3264 = vmatprep.subr.mxu0 %v3363_v60 }
 0x2bc   :  { %3265 = vmatpush3.msra.mxu0 %v2737_v9 }
 0x2bd   :  { %3266 = vmatprep.subr.mxu0 %v3363_v60 }
 0x2be   :  { %3267 = vmatpush3.msra.mxu0 %v2736_v34 }
 0x2bf   :  { %3268 = vmatprep.subr.mxu0 %v3363_v60 }
 0x2c0   :  { %3269 = vmatpush3.msra.mxu0 %v2735_v48 }
 0x2c1   :  { %3270 = vmatprep.subr.mxu0 %v3363_v60 }
 0x2c2   :  { %3271 = vmatpush3.msra.mxu0 %v2734_v0 }
 0x2c3   :  { %3275 = vmatprep.subr.mxu0 %v3363_v60 }
 0x373   :  { %v2638_v20 = vpop.f32.mrf.mxu0 }
 0x374   :  { %v2639_v63 = vadd.f32 %v3156_v11, %v2638_v20 }
 0x375   :  { %v3220_v55 = vpop.f32.mrf.mxu0 }
 0x376   :  { %v2642_v59 = vmax.f32 %v2639_v63, 0.0 }
 0x378   :  { %3254 = vmatmul.mubr.f32.vlgmr.msra.gmra.mxu1 %v2642_v59 }
 0x379   :  { %3284 = vmatprep.mubr.msk.f32.mxu1 %vm3364_vm3, %v3363_v60  ;;  %3283 = vmatpush3.msra.mxu1 %v2926_v30 }
 0x438   :  { %v2730_v3 = vpop.f32.mrf.mxu1 }
 0x439   :  { %v2731_v25 = vadd.f32 %v3158_v58, %v2730_v3 }
 0x43a   :  { %v3255_v14 = vpop.f32.mrf.mxu1 }
 0x43b   :  { %v2742_v2 = vmul.f32 %v2731_v25, %v2731_v25 }
 0x43d   :  { %3273 = vmatmul.mubr.msk.f32.vlgmr.msra.gmra.mxu0 %vm2568_vm4, %v2742_v2 }
 0x43e   :  { %3279 = vmatprep.mubr.msk.f32.mxu0 %vm3364_vm3, %v3363_v60  ;;  %3276 = vmatpush3.msra.mxu0 %v2828_v5 }
 0x43f   :  { %3277 = vmatprep.subr.mxu0 %v3363_v60 }
 0x440   :  { %3278 = vmatpush3.msra.mxu0 %v2827_v7 }
 0x4fd   :  { %v2812_v19 = vpop.f32.mrf.mxu0 }
 0x4fe   :  { %v2816_v33 = vmax.f32 %v2812_v19, 1e-24 }
 0x4ff   :  { %v3274_v16 = vpop.f32.mrf.mxu0 }
 0x500   :  { %3359 = vrsqrt.f32 %v2816_v33 }
 0x50d   :  { %v3360_v54 = vpop.eup %3359 }
 0x50e   :  { %v2818_v24 = vmul.f32 %v3360_v54, %v2731_v25 }
 0x510   :  { %2922 = vrot.lane.b32.xlu0 %v2818_v24, %s3365_s22  ;;  %3280 = vmatmul.mubr.msk.f32.vlgmr.msra.gmra.mxu0 %vm2841_vm5, %v2818_v24  ;;  %2820 = vst.msk [vmem:[%s4494_s2] sm:$0x3f] %vm2819_vm6, %v2818_v24  ;;  %v2829_v4 = vrot.slane %v2818_v24, 6 }
 0x582   :  { %v2923_v60 = vpop.permute.xlu0 %2922 }
 0x583   :  { %v2925_v13 = vadd.f32 %v2923_v60, %v2818_v24 }
 0x585   :  { %2943 = vrot.lane.b32.xlu0 %v2925_v13, %s3366_s27  ;;  %v2928_v12 = vrot.slane %v2925_v13, 6 }
 0x587   :  { %2929 = vrot.lane.b32.xlu1 %v2928_v12, %s3367_s28 }
 0x58b   :  { %2830 = vrot.lane.b32.xlu1 %v2829_v4, %s3367_s28 }
 0x5d0   :  { %v2910_v1 = vpop.f32.mrf.mxu0 }
 0x5d1   :  { %v2914_v22 = vmul.f32 14.285714, %v2910_v1 }
 0x5d2   :  { %v3281_v8 = vpop.f32.mrf.mxu0 }
 0x5f7   :  { %v2944_v42 = vpop.permute.xlu0 %2943 }
 0x5f8   :  { %3285 = vmatmul.mubr.msk.f32.vlgmr.msra.gmra.mxu1 %vm2945_vm7, %v2944_v42 }
 0x5f9   :  { %v2930_v39 = vpop.permute.xlu1 %2929 }
 0x5fa   :  { %v2932_v49 = vmul.f32 %v2930_v39, %v2925_v13 }
 0x5fc   :  { %2934 = vrot.lane.b32.xlu0 %v2932_v49, %s3366_s27 }
 0x5fd   :  { %v2831_v62 = vpop.permute.xlu1 %2830 }
 0x5fe   :  { %v2833_v61 = vmul.f32 %v2831_v62, %v2818_v24 }
 0x600   :  { %v2835_v47 = vsel %vm2834_vm8, %v2833_v61, 0.0 }
 0x601   :  { %2836 = vadd.xlane.f32.xlu1 %v2835_v47 }
 0x612   :  { %2916 = vrot.lane.b32.xlu1 %v2914_v22, %s3368_s1 }
 0x66e   :  { %v2935_v44 = vpop.permute.xlu0 %2934 }
 0x66f   :  { %v2938_v53 = vsel %vm2937_vm9, %v2935_v44, 0.0 }
 0x670   :  { %2939 = vadd.xlane.f32.xlu0 %v2938_v53 }
 0x686   :  { %2822 = vrot.lane.b32.xlu0 %v2818_v24, %s3367_s28 }
 0x68a   :  { %v2837_v18 = vpop.xlane.xlu1 %2836 }
 0x68b   :  { %v2838_v38 = vmul.f32 14.285714, %v2837_v18 }
 0x68d   :  { %2840 = vst.msk [vmem:[%s4494_s2 + $0x8] sm:$0x3] %vm2839_vm10, %v2838_v38 }
 0x68e   :  { %v2917_v36 = vpop.permute.xlu1 %2916 }
 0x68f   :  { %2920 = vst.msk [vmem:[%s4494_s2 + $0x8] sm:$0x3] %vm2919_vm11, %v2917_v36 }
 0x6b8   :  { %v3014_v15 = vpop.f32.mrf.mxu1 }
 0x6b9   :  { %v3018_v31 = vmul.f32 3.5714285, %v3014_v15 }
 0x6ba   :  { %v3286_v40 = vpop.f32.mrf.mxu1 }
 0x6bb   :  { %3020 = vrot.lane.b32.xlu1 %v3018_v31, %s3368_s1 }
 0x6f9   :  { %v2940_v32 = vpop.xlane.xlu0 %2939 }
 0x6fa   :  { %v2941_v17 = vmul.f32 3.5714285, %v2940_v32 }
 0x6fc   :  { %2942 = vst.msk [vmem:[%s4494_s2 + $0xa] sm:$0x3] %vm2839_vm10, %v2941_v17 }
 0x6fd   :  { %v2823_v45 = vpop.permute.xlu0 %2822 }
 0x6fe   :  { %2826 = vst.msk [vmem:[%s4494_s2] sm:$0xc0] %vm2825_vm12, %v2823_v45 }
 0x72d   :  { %v3021_v35 = vpop.permute.xlu1 %3020 }
 0x72e   :  { %3023 = vst.msk [vmem:[%s4494_s2 + $0xa] sm:$0x3] %vm2919_vm11, %v3021_v35 }

</bundles_post_ra>
